<compile_context>
chip_gen: v7x
topology: tpu7x:2x2x1
jax: 0.10.0
libtpu: 0.0.40
codegen_flags: <defaults>
</compile_context>

<pallas_src>
import functools

import jax
import jax.numpy as jnp
from jax import lax
from jax.experimental import pallas as pl
from jax.experimental.pallas import tpu as pltpu

# Align reference (XLA) matmuls and in-kernel f32 dots to true f32 precision
# so the f32 validation path can be compared at tight tolerances.
jax.config.update("jax_default_matmul_precision", "highest")


def _round_up(x, m):
    return (x + m - 1) // m * m


def _pick_tile(dim, candidates):
    for c in candidates:
        if c <= dim and dim % c == 0:
            return c
    return dim


def _detect_vmem_limit():
    try:
        cap = getattr(pltpu.get_tpu_info(), "vmem_capacity_bytes", None)
        if cap is not None and cap >= 128 * 1024 * 1024:
            return 96 * 1024 * 1024        # v5e / v6e: 128 MiB physical VMEM
    except Exception:
        pass
    return 48 * 1024 * 1024                # v7x (64 MiB/TC) / unknown


def _detect_num_tensorcores():
    try:
        info = pltpu.get_tpu_info()
        for name in ("num_cores", "num_tensorcores", "tensor_cores_per_chip",
                     "cores_per_chip", "core_count"):
            v = getattr(info, name, None)
            if isinstance(v, int) and 1 <= v <= 16:
                return v
    except Exception:
        pass
    return 1


_VMEM_LIMIT = _detect_vmem_limit()
_NUM_TC = _detect_num_tensorcores()


# ---------------------------------------------------------------------------
# Tiled matmul + bias kernel (hoisted input projection, fallback vocab proj).
# ---------------------------------------------------------------------------
def _matmul_bias_kernel(a_ref, w_ref, b_ref, o_ref):
    o_ref[...] = (jnp.dot(a_ref[...], w_ref[...],
                          preferred_element_type=jnp.float32)
                  + b_ref[...]).astype(o_ref.dtype)


def _matmul_bias(a, w, b, *, out_dtype=jnp.float32, n_major=False):
    """(M, K) @ (K, N) + (1, N) -> (M, N).  K, N multiples of 128; M padded
    internally.  n_major=True makes the N axis the outer grid axis so the
    (K, N) weight streams from HBM exactly once (best when W >> A)."""
    M, K = a.shape
    N = w.shape[1]
    tm = 256 if M >= 256 else _round_up(max(M, 8), 8)
    Mp = _round_up(M, tm)
    if Mp != M:
        a = jnp.pad(a, ((0, Mp - M), (0, 0)))
    tn_cands = (1024, 512, 256, 128) if _VMEM_LIMIT >= 80 * 1024 * 1024 \
        else (512, 256, 128)
    tn = _pick_tile(N, tn_cands)

    if n_major:
        grid = (N // tn, Mp // tm)
        a_spec = pl.BlockSpec((tm, K), lambda j, i: (i, 0))
        w_spec = pl.BlockSpec((K, tn), lambda j, i: (0, j))
        b_spec = pl.BlockSpec((1, tn), lambda j, i: (0, j))
        o_spec = pl.BlockSpec((tm, tn), lambda j, i: (i, j))
    else:
        grid = (Mp // tm, N // tn)
        a_spec = pl.BlockSpec((tm, K), lambda i, j: (i, 0))
        w_spec = pl.BlockSpec((K, tn), lambda i, j: (0, j))
        b_spec = pl.BlockSpec((1, tn), lambda i, j: (0, j))
        o_spec = pl.BlockSpec((tm, tn), lambda i, j: (i, j))

    out = pl.pallas_call(
        _matmul_bias_kernel,
        out_shape=jax.ShapeDtypeStruct((Mp, N), out_dtype),
        grid_spec=pltpu.PrefetchScalarGridSpec(
            num_scalar_prefetch=0,
            grid=grid,
            in_specs=[a_spec, w_spec, b_spec],
            out_specs=o_spec),
        compiler_params=pltpu.CompilerParams(
            dimension_semantics=("parallel", "parallel"),
            vmem_limit_bytes=_VMEM_LIMIT),
    )(a, w, b)
    return out[:M] if Mp != M else out


# ---------------------------------------------------------------------------
# Recurrent kernel: 2-layer LSTM over TT timesteps per grid step, with an
# optional fused hidden->vocab epilogue per TT block.
# ---------------------------------------------------------------------------
def _recurrent_kernel(*refs, hidden_dim, vocab_pad, tt, has_init, fuse_vocab,
                      unroll):
    idx = 0
    g0x_ref = refs[idx]; idx += 1
    if has_init:
        h0_ref = refs[idx]; c0_ref = refs[idx + 1]; idx += 2
    whh0_ref = refs[idx]; wih1_ref = refs[idx + 1]
    whh1_ref = refs[idx + 2]; b1_ref = refs[idx + 3]; idx += 4
    if fuse_vocab:
        wout_ref = refs[idx]; bout_ref = refs[idx + 1]; idx += 2
        logits_ref = refs[idx]; idx += 1
    else:
        h1_ref = refs[idx]; idx += 1
    hn_ref = refs[idx]; cn_ref = refs[idx + 1]; idx += 2
    h_sc = refs[idx]; c_sc = refs[idx + 1]; idx += 2
    h1blk_sc = refs[idx] if fuse_vocab else None

    t = pl.program_id(1)
    H = hidden_dim
    bt = h_sc.shape[1]

    @pl.when(t == 0)
    def _():
        if has_init:
            h_sc[...] = h0_ref[...]
            c_sc[...] = c0_ref[...]
        else:
            h_sc[...] = jnp.zeros_like(h_sc)
            c_sc[...] = jnp.zeros_like(c_sc)

    whh0 = whh0_ref[...]          # (H, 4H) mxu dtype
    wih1 = wih1_ref[...]          # (H, 4H)
    whh1 = whh1_ref[...]          # (H, 4H)
    mxu_dt = whh0.dtype
    # Hoisted bias broadcast (not re-emitted per unrolled step).
    b1b = jnp.broadcast_to(b1_ref[...], (bt, 4 * H))

    def gate_math(gates, c_prev):
        i = jax.nn.sigmoid(gates[:, 0 * H:1 * H])
        f = jax.nn.sigmoid(gates[:, 1 * H:2 * H])
        g = jnp.tanh(gates[:, 2 * H:3 * H])
        o = jax.nn.sigmoid(gates[:, 3 * H:4 * H])
        c_new = f * c_prev + i * g
        h_new = o * jnp.tanh(c_new)
        return h_new, c_new

    def body(k, carry):
        h0p, c0p, h1p, c1p = carry
        # Layer 0: input projection precomputed -> only h @ W_hh here.
        gates0 = g0x_ref[k].astype(jnp.float32) + jnp.dot(
            h0p.astype(mxu_dt), whh0, preferred_element_type=jnp.float32)
        h0n, c0n = gate_math(gates0, c0p)
        # Layer 1: two dots (no per-step concat -> no VMEM copy per step).
        gates1 = (jnp.dot(h0n.astype(mxu_dt), wih1,
                          preferred_element_type=jnp.float32)
                  + jnp.dot(h1p.astype(mxu_dt), whh1,
                            preferred_element_type=jnp.float32)
                  + b1b)
        h1n, c1n = gate_math(gates1, c1p)
        if fuse_vocab:
            h1blk_sc[k] = h1n
        else:
            h1_ref[k] = h1n.astype(h1_ref.dtype)
        return (h0n, c0n, h1n, c1n)

    carry = (h_sc[0], c_sc[0], h_sc[1], c_sc[1])
    carry = lax.fori_loop(0, tt, body, carry, unroll=unroll)
    h0n, c0n, h1n, c1n = carry
    h_sc[0] = h0n
    c_sc[0] = c0n
    h_sc[1] = h1n
    c_sc[1] = c1n

    @pl.when(t == pl.num_programs(1) - 1)
    def _():
        hn_ref[...] = h_sc[...]
        cn_ref[...] = c_sc[...]

    if fuse_vocab:
        # Fused hidden -> vocab epilogue on the TT block already in VMEM.
        h1blk = h1blk_sc[...].reshape(tt * bt, H).astype(wout_ref.dtype)
        logits = jnp.dot(h1blk, wout_ref[...],
                         preferred_element_type=jnp.float32) + bout_ref[...]
        logits_ref[...] = logits.reshape(tt, bt, vocab_pad).astype(
            logits_ref.dtype)


# ---------------------------------------------------------------------------
# Wrapper
# ---------------------------------------------------------------------------
def poetry_forward(tokens, params, hidden=None, *,
                   mxu_dtype=jnp.bfloat16, fuse_vocab=None):
    """Pallas equivalent of PoetryModel.forward.

    tokens: int32 (T, B)
    returns: (logits (T*B, V), (h_n (2, B, H), c_n (2, B, H)))
    """
    T, B = tokens.shape
    emb_table = params["embedding"]            # (V, E)
    V, E = emb_table.shape
    H = params["w_hh_l0"].shape[1]

    f32 = jnp.float32
    mxu_dt = jnp.dtype(mxu_dtype)
    Hp = _round_up(H, 128)     # lane-dense hidden
    Vp = _round_up(V, 128)     # lane-dense vocab
    Ep = _round_up(E, 128)     # lane-dense embedding (MXU K occupancy)
    Bp = _round_up(B, 8)       # sublane-dense batch
    H4p = 4 * Hp

    # --- weight padding helpers (zeros keep padded state at exactly 0) -----
    def pad_gate_cols(w_t):                    # (in, 4H) -> (in, 4Hp)
        in_dim = w_t.shape[0]
        w4 = w_t.astype(f32).reshape(in_dim, 4, H)
        w4 = jnp.pad(w4, ((0, 0), (0, 0), (0, Hp - H)))
        return w4.reshape(in_dim, H4p)

    def pad_rows(w, rows_p):
        return jnp.pad(w, ((0, rows_p - w.shape[0]), (0, 0)))

    def pad_gate_bias(b):                      # (4H,) -> (1, 4Hp)
        b4 = b.astype(f32).reshape(4, H)
        b4 = jnp.pad(b4, ((0, 0), (0, Hp - H)))
        return b4.reshape(1, H4p)

    wih0_tp = pad_rows(pad_gate_cols(params["w_ih_l0"].T), Ep).astype(mxu_dt)
    whh0_tp = pad_rows(pad_gate_cols(params["w_hh_l0"].T), Hp).astype(mxu_dt)
    b0p = pad_gate_bias(params["b_ih_l0"] + params["b_hh_l0"])
    wih1_tp = pad_rows(pad_gate_cols(params["w_ih_l1"].T), Hp).astype(mxu_dt)
    whh1_tp = pad_rows(pad_gate_cols(params["w_hh_l1"].T), Hp).astype(mxu_dt)
    b1p = pad_gate_bias(params["b_ih_l1"] + params["b_hh_l1"])

    wout_tp = jnp.pad(params["w_linear"].T.astype(f32),
                      ((0, Hp - H), (0, Vp - V))).astype(mxu_dt)     # (Hp, Vp)
    boutp = jnp.pad(params["b_linear"].astype(f32),
                    (0, Vp - V)).reshape(1, Vp)                      # (1, Vp)

    # --- embedding gather (plain JAX glue; data-dependent) ------------------
    embeds = emb_table[tokens].astype(f32)                           # (T, B, E)
    embeds_p = jnp.pad(embeds, ((0, 0), (0, Bp - B), (0, Ep - E))
                       ).astype(mxu_dt)                              # (T, Bp, Ep)

    # --- hoisted layer-0 input projection (one big matmul) -----------------
    gates0x = _matmul_bias(embeds_p.reshape(T * Bp, Ep), wih0_tp, b0p,
                           out_dtype=mxu_dt)
    gates0x = gates0x.reshape(T, Bp, H4p)

    # --- recurrence ---------------------------------------------------------
    has_init = hidden is not None
    if has_init:
        h0, c0 = hidden
        h0p = jnp.pad(h0.astype(f32), ((0, 0), (0, Bp - B), (0, Hp - H)))
        c0p = jnp.pad(c0.astype(f32), ((0, 0), (0, Bp - B), (0, Hp - H)))

    TT = _pick_tile(T, (16, 8, 4, 2, 1))       # timesteps per grid step
    unroll = TT if TT <= 8 else 4              # partial unroll avoids spills
    split_batch = (_NUM_TC >= 2) and (Bp % 16 == 0)   # only shard on 2-TC chips
    bt = Bp // 2 if split_batch else Bp
    nb, nt = Bp // bt, T // TT

    if fuse_vocab is None:
        fused_extra = (Hp * Vp * mxu_dt.itemsize    # resident W_out (1 buffer)
                       + 2 * TT * bt * Vp * 4       # double-buffered logits blk
                       + TT * bt * Hp * 4)          # h1 block scratch
        fuse_vocab = fused_extra <= 24 * 1024 * 1024

    kernel = functools.partial(
        _recurrent_kernel, hidden_dim=Hp, vocab_pad=Vp, tt=TT,
        has_init=has_init, fuse_vocab=fuse_vocab, unroll=unroll)

    def run_recurrent(use_buffered_hint):
        def const_spec(shape):
            idx_map = lambda b, t: (0,) * len(shape)
            if use_buffered_hint:
                # Constant-index weights: single buffer (saves VMEM on v7x).
                return pl.BlockSpec(shape, idx_map,
                                    pipeline_mode=pl.Buffered(1))
            return pl.BlockSpec(shape, idx_map)

        g0x_spec = pl.BlockSpec((TT, bt, H4p), lambda b, t: (t, b, 0))
        state_spec = pl.BlockSpec((2, bt, Hp), lambda b, t: (0, b, 0))

        in_specs = [g0x_spec]
        args = [gates0x]
        if has_init:
            in_specs += [state_spec, state_spec]
            args += [h0p, c0p]
        in_specs += [const_spec((Hp, H4p)), const_spec((Hp, H4p)),
                     const_spec((Hp, H4p)), const_spec((1, H4p))]
        args += [whh0_tp, wih1_tp, whh1_tp, b1p]
        if fuse_vocab:
            in_specs += [const_spec((Hp, Vp)), const_spec((1, Vp))]
            args += [wout_tp, boutp]

        if fuse_vocab:
            main_shape = jax.ShapeDtypeStruct((T, Bp, Vp), f32)
            main_spec = pl.BlockSpec((TT, bt, Vp), lambda b, t: (t, b, 0))
        else:
            main_shape = jax.ShapeDtypeStruct((T, Bp, Hp), mxu_dt)
            main_spec = pl.BlockSpec((TT, bt, Hp), lambda b, t: (t, b, 0))

        scratch = [pltpu.VMEM((2, bt, Hp), f32),      # carried h (layers 0,1)
                   pltpu.VMEM((2, bt, Hp), f32)]      # carried c
        if fuse_vocab:
            scratch.append(pltpu.VMEM((TT, bt, Hp), f32))   # h1 block

        outs = pl.pallas_call(
            kernel,
            out_shape=(main_shape,
                       jax.ShapeDtypeStruct((2, Bp, Hp), f32),
                       jax.ShapeDtypeStruct((2, Bp, Hp), f32)),
            grid_spec=pltpu.PrefetchScalarGridSpec(
                num_scalar_prefetch=0,
                grid=(nb, nt),
                in_specs=in_specs,
                out_specs=[main_spec, state_spec, state_spec],
                scratch_shapes=scratch),
            compiler_params=pltpu.CompilerParams(
                dimension_semantics=("parallel", "arbitrary"),
                vmem_limit_bytes=_VMEM_LIMIT),
        )(*args)
        jax.block_until_ready(outs)
        return outs

    try:
        main_out, hn_p, cn_p = run_recurrent(True)
    except Exception:
        # Fallback if single-buffer pipeline hint is unsupported on this jax.
        main_out, hn_p, cn_p = run_recurrent(False)

    # --- hidden -> vocab projection -----------------------------------------
    if fuse_vocab:
        logits = main_out[:, :B, :V].reshape(T * B, V)
    else:
        # N-major grid: the (Hp, Vp) weight streams from HBM exactly once.
        logits_full = _matmul_bias(main_out.reshape(T * Bp, Hp), wout_tp,
                                   boutp, out_dtype=f32, n_major=True)
        logits = logits_full.reshape(T, Bp, Vp)[:, :B, :V].reshape(T * B, V)

    hn = hn_p[:, :B, :H]
    cn = cn_p[:, :B, :H]
    return logits, (hn, cn)


# ---------------------------------------------------------------------------
# Pure-JAX reference
# ---------------------------------------------------------------------------
def poetry_forward_ref(tokens, params, hidden=None):
    T, B = tokens.shape
    H = params["w_hh_l0"].shape[1]
    emb = params["embedding"][tokens].astype(jnp.float32)
    if hidden is None:
        h0 = jnp.zeros((2, B, H), jnp.float32)
        c0 = jnp.zeros((2, B, H), jnp.float32)
    else:
        h0, c0 = hidden

    def cell(x, h, c, wih, whh, bih, bhh):
        gates = x @ wih.T + bih + h @ whh.T + bhh
        i, f, g, o = jnp.split(gates, 4, axis=-1)
        i, f, o = jax.nn.sigmoid(i), jax.nn.sigmoid(f), jax.nn.sigmoid(o)
        g = jnp.tanh(g)
        c_new = f * c + i * g
        h_new = o * jnp.tanh(c_new)
        return h_new, c_new

    def scan_fn(carry, x_t):
        h0_, c0_, h1_, c1_ = carry
        h0n, c0n = cell(x_t, h0_, c0_, params["w_ih_l0"], params["w_hh_l0"],
                        params["b_ih_l0"], params["b_hh_l0"])
        h1n, c1n = cell(h0n, h1_, c1_, params["w_ih_l1"], params["w_hh_l1"],
                        params["b_ih_l1"], params["b_hh_l1"])
        return (h0n, c0n, h1n, c1n), h1n

    carry, hs = jax.lax.scan(scan_fn, (h0[0], c0[0], h0[1], c0[1]), emb)
    out = hs.reshape(T * B, H) @ params["w_linear"].T + params["b_linear"]
    hn = jnp.stack([carry[0], carry[2]])
    cn = jnp.stack([carry[1], carry[3]])
    return out, (hn, cn)


def init_params(key, vocab_size, embedding_dim, hidden_dim):
    ks = jax.random.split(key, 12)
    s = 0.1
    H4 = 4 * hidden_dim
    return {
        "embedding": s * jax.random.normal(ks[0], (vocab_size, embedding_dim), jnp.float32),
        "w_ih_l0": s * jax.random.normal(ks[1], (H4, embedding_dim), jnp.float32),
        "w_hh_l0": s * jax.random.normal(ks[2], (H4, hidden_dim), jnp.float32),
        "b_ih_l0": s * jax.random.normal(ks[3], (H4,), jnp.float32),
        "b_hh_l0": s * jax.random.normal(ks[4], (H4,), jnp.float32),
        "w_ih_l1": s * jax.random.normal(ks[5], (H4, hidden_dim), jnp.float32),
        "w_hh_l1": s * jax.random.normal(ks[6], (H4, hidden_dim), jnp.float32),
        "b_ih_l1": s * jax.random.normal(ks[7], (H4,), jnp.float32),
        "b_hh_l1": s * jax.random.normal(ks[8], (H4,), jnp.float32),
        "w_linear": s * jax.random.normal(ks[9], (vocab_size, hidden_dim), jnp.float32),
        "b_linear": s * jax.random.normal(ks[10], (vocab_size,), jnp.float32),
    }


if __name__ == "__main__":
    VOCAB, EMB, HID = 32, 16, 32
    SEQ, BATCH = 8, 2

    key = jax.random.PRNGKey(0)
    k_param, k_tok, k_h, k_c = jax.random.split(key, 4)
    params = init_params(k_param, VOCAB, EMB, HID)
    tokens = jax.random.randint(k_tok, (SEQ, BATCH), 0, VOCAB, dtype=jnp.int32)
    h0 = 0.1 * jax.random.normal(k_h, (2, BATCH, HID), jnp.float32)
    c0 = 0.1 * jax.random.normal(k_c, (2, BATCH, HID), jnp.float32)

    out_ref, (hn_ref, cn_ref) = poetry_forward_ref(tokens, params)
    out2_ref, (hn2_ref, cn2_ref) = poetry_forward_ref(tokens, params, (h0, c0))

    # Case 1: f32 MXU path, hidden=None, fused vocab epilogue (auto).
    out1, (hn1, cn1) = poetry_forward(tokens, params, mxu_dtype=jnp.float32)
    jax.block_until_ready((out1, hn1, cn1))
    assert out1.shape == (SEQ * BATCH, VOCAB)
    assert hn1.shape == (2, BATCH, HID) and cn1.shape == (2, BATCH, HID)
    assert jnp.allclose(out1, out_ref, rtol=1e-3, atol=1e-3)
    assert jnp.allclose(hn1, hn_ref, rtol=1e-3, atol=1e-3)
    assert jnp.allclose(cn1, cn_ref, rtol=1e-3, atol=1e-3)

    # Case 2: f32 path, explicit hidden, split vocab matmul (N-major grid).
    out2, (hn2, cn2) = poetry_forward(tokens, params, (h0, c0),
                                      mxu_dtype=jnp.float32, fuse_vocab=False)
    jax.block_until_ready((out2, hn2, cn2))
    assert jnp.allclose(out2, out2_ref, rtol=1e-3, atol=1e-3)
    assert jnp.allclose(hn2, hn2_ref, rtol=1e-3, atol=1e-3)
    assert jnp.allclose(cn2, cn2_ref, rtol=1e-3, atol=1e-3)

    # Case 3: default bf16 MXU operands (f32 gate math / accumulation).
    out3, (hn3, cn3) = poetry_forward(tokens, params, (h0, c0))
    jax.block_until_ready((out3, hn3, cn3))
    assert float(jnp.max(jnp.abs(out3 - out2_ref))) < 5e-2
    assert float(jnp.max(jnp.abs(hn3 - hn2_ref))) < 5e-2
    assert float(jnp.max(jnp.abs(cn3 - cn2_ref))) < 5e-2

    print("KERNEL_OK")
</pallas_src>

<mosaic_0001>
module attributes {stable_mosaic.version = 11 : i64} {
  func.func @_matmul_bias_kernel(%arg0: i32, %arg1: i32, %arg2: memref<64x128xf32, #tpu.memory_space<vmem>>, %arg3: memref<128x512xf32, #tpu.memory_space<vmem>>, %arg4: memref<1x512xf32, #tpu.memory_space<vmem>>, %arg5: memref<64x512xf32, #tpu.memory_space<vmem>>) attributes {dimension_semantics = [#tpu.dimension_semantics<parallel>, #tpu.dimension_semantics<parallel>], iteration_bounds = array<i64: 1, 1>, scalar_prefetch = 0 : i64, scratch_operands = 0 : i64, tpu.core_type = #tpu.core_type<tc>, window_params = [{transform_indices = @transform_0, window_bounds = array<i64: 64, 128>}, {transform_indices = @transform_1, window_bounds = array<i64: 128, 512>}, {transform_indices = @transform_2, window_bounds = array<i64: 1, 512>}, {transform_indices = @transform_3, window_bounds = array<i64: 64, 512>}]} {
    %c0 = arith.constant 0 : index
    %c0_0 = arith.constant 0 : index
    %0 = vector.load %arg2[%c0, %c0_0] : memref<64x128xf32, #tpu.memory_space<vmem>>, vector<64x128xf32>
    %c0_1 = arith.constant 0 : index
    %c0_2 = arith.constant 0 : index
    %1 = vector.load %arg3[%c0_1, %c0_2] : memref<128x512xf32, #tpu.memory_space<vmem>>, vector<128x512xf32>
    %cst = arith.constant dense<0.000000e+00> : vector<64x512xf32>
    %2 = tpu.matmul %0, %1, %cst {dimension_numbers = #tpu.dot_dimension_numbers<[1], [0], [0], [1], [0, 0, 1, 1], [], []>, precision = #tpu.contract_precision<fp32>} : vector<64x128xf32>, vector<128x512xf32>, vector<64x512xf32> -> vector<64x512xf32>
    %c0_3 = arith.constant 0 : index
    %c0_4 = arith.constant 0 : index
    %3 = vector.load %arg4[%c0_3, %c0_4] : memref<1x512xf32, #tpu.memory_space<vmem>>, vector<1x512xf32>
    %4 = vector.broadcast %3 : vector<1x512xf32> to vector<64x512xf32>
    %5 = arith.addf %2, %4 : vector<64x512xf32>
    %c0_5 = arith.constant 0 : index
    %c0_6 = arith.constant 0 : index
    %6 = vector.load %arg5[%c0_5, %c0_6] : memref<64x512xf32, #tpu.memory_space<vmem>>, vector<64x512xf32>
    tpu.vector_store %arg5[%c0_5, %c0_6], %5 {strides = array<i32>} : memref<64x512xf32, #tpu.memory_space<vmem>>, vector<64x512xf32>,
    return
  }
  func.func @transform_0(%arg0: i32, %arg1: i32) -> (i32, i32) {
    %c0_i32 = arith.constant 0 : i32
    %c0_i32_0 = arith.constant 0 : i32
    return %arg0, %c0_i32 : i32, i32
  }
  func.func @transform_1(%arg0: i32, %arg1: i32) -> (i32, i32) {
    %c0_i32 = arith.constant 0 : i32
    %c0_i32_0 = arith.constant 0 : i32
    return %c0_i32, %arg1 : i32, i32
  }
  func.func @transform_2(%arg0: i32, %arg1: i32) -> (i32, i32) {
    %c0_i32 = arith.constant 0 : i32
    %c0_i32_0 = arith.constant 0 : i32
    return %c0_i32, %arg1 : i32, i32
  }
  func.func @transform_3(%arg0: i32, %arg1: i32) -> (i32, i32) {
    %c0_i32 = arith.constant 0 : i32
    return %arg0, %arg1 : i32, i32
  }
}

</mosaic_0001>

<bundles_post_ra>
// kernel: tpu_custom_call.1
= control target key start
LH: loop header
LB: loop body
LE: loop exit
PB: predicated region body
PF: predicated region fallthrough
CT: control target
= control target key end

     0   :  { %8 = vsyncpa [#allocation3], 0  ;;  %s4419_s0 = inlined_call_operand.hbm [shape: f32[64,128], index: 0, kind: input, shape index: {}]   ;;  %s4420_s1 = inlined_call_operand.hbm [shape: f32[128,512], index: 1, kind: input, shape index: {}]   ;;  %s4421_s2 = inlined_call_operand.vmem [shape: f32[1,512], index: 2, kind: input, shape index: {}]   ;;  %s4422_s3 = inlined_call_operand.hbm [shape: f32[64,512], index: 3, kind: output, shape index: {}]  }
   0x1   :  { %9 = vsyncpa [#allocation6], 0 }
   0x2   :  { %10 = vsyncpa [#allocation4], 0  ;;  %s3239_s12 = smov [#allocation2]   ;;  %s3167_s16 = scalar_lea.hbm %s4419_s0, 1024 }
   0x3   :  { %s16_s13 = sshll.u32 %s3239_s12, 4  ;;  %p3168_p0 = scmp.ne.s32.totalorder %s4419_s0, %s3167_s16  ;;  %s17_s13 = int_to_ptr.vmem [resolvable:$true] %s16_s13 }
   0x4   :  { %p3171_p1 = scmp.lt.u32.totalorder %s3167_s16, %s4419_s0 }
   0x6   :  { %p3173_p2 = pnand %p3171_p1, %p3168_p0 }
   0x8   :  { %3176 = shalt.err (!%p3173_p2)
}
   0x9   :  { %s3177_s21 = scalar_lea.vmem %s17_s13, 1024  ;;  %p3182_p4 = scmp.lt.s32.totalorder %s17_s13, %s17_s13 }
   0xa   :  { %p3178_p3 = scmp.ne.s32.totalorder %s17_s13, %s3177_s21  ;;  %p3183_p5 = scmp.lt.s32.totalorder %s3177_s21, %s3177_s21 }
   0xc   :  { %p3184_p6 = por %p3183_p5, %p3182_p4 }
   0xe   :  { %p3185_p7 = pnand %p3184_p6, %p3178_p3 }
  0x10   :  { %3188 = shalt.err (!%p3185_p7)
}
  0x11   :  { %s3240_s22 = smov 128   ;;  %s3241_s23 = smov 8  }
  0x12   :  { %22 = dma.hbm_to_vmem [thread:$0]  %s4419_s0, 1024, %s17_s13, [#allocation3], %s3240_s22, %s3240_s22, %s3241_s23  }
  0x13   :  { %s3242_s26 = smov [#allocation5]   ;;  %s3189_s30 = scalar_lea.hbm %s4420_s1, 8192 }
  0x14   :  { %s28_s27 = sshll.u32 %s3242_s26, 4  ;;  %p3190_p8 = scmp.ne.s32.totalorder %s4420_s1, %s3189_s30  ;;  %s29_s27 = int_to_ptr.vmem [resolvable:$true] %s28_s27 }
  0x15   :  { %p3193_p9 = scmp.lt.u32.totalorder %s3189_s30, %s4420_s1 }
  0x17   :  { %p3195_p10 = pnand %p3193_p9, %p3190_p8 }
  0x19   :  { %3198 = shalt.err (!%p3195_p10)
}
  0x1a   :  { %s3199_s8 = scalar_lea.vmem %s29_s27, 8192  ;;  %p3204_p12 = scmp.lt.s32.totalorder %s29_s27, %s29_s27 }
  0x1b   :  { %p3200_p11 = scmp.ne.s32.totalorder %s29_s27, %s3199_s8  ;;  %p3205_p13 = scmp.lt.s32.totalorder %s3199_s8, %s3199_s8 }
  0x1d   :  { %p3206_p0 = por %p3205_p13, %p3204_p12 }
  0x1f   :  { %p3207_p1 = pnand %p3206_p0, %p3200_p11 }
  0x21   :  { %3210 = shalt.err (!%p3207_p1)
}
  0x22   :  { %s3243_s0 = smov 512   ;;  %s3244_s9 = smov 32  }
  0x23   :  { %34 = dma.hbm_to_vmem [thread:$0]  %s4420_s1, 8192, %s29_s27, [#allocation6], %s3243_s0, %s3243_s0, %s3244_s9  }
  0x24   :  { %3233 = dma.done.wait [#allocation3], 1024  }
  0x25   :  { %3234 = vsyncadd [#allocation3], 4294966272 }
  0x26   :  { %3235 = dma.done.wait [#allocation6], 8192  }
  0x27   :  { %3236 = vsyncadd [#allocation6], 4294959104  ;;  %v4423_v0 = vmov 0.0   ;;  %v52_v1 = vld [vmem:[#allocation5 + $0x8] sm:$0xff]  ;;  %v54_v3 = vld [vmem:[#allocation5 + $0x18] sm:$0xff] }
  0x28   :  { %233 = vmatprep.mubr.f32.mxu0 %v4423_v0  ;;  %1431 = vmatprep.mubr.f32.mxu1 %v4423_v0  ;;  %v56_v2 = vld [vmem:[#allocation5 + $0x28] sm:$0xff]  ;;  %v137_v4 = vand.u32 4294901760, %v52_v1  ;;  %v58_v6 = vld [vmem:[#allocation5 + $0x38] sm:$0xff]  ;;  %v1335_v7 = vand.u32 4294901760, %v54_v3  ;;  %v51_v8 = vld [vmem:[#allocation5] sm:$0xff] }
  0x29   :  { %v141_v5 = vand.u32 4294901760, %v56_v2  ;;  %v55_v9 = vld [vmem:[#allocation5 + $0x20] sm:$0xff]  ;;  %v1339_v10 = vand.u32 4294901760, %v58_v6  ;;  %v139_v11 = vand.u32 4294901760, %v51_v8  ;;  %v53_v13 = vld [vmem:[#allocation5 + $0x10] sm:$0xff]  ;;  %v60_v15 = vld [vmem:[#allocation5 + $0x48] sm:$0xff] }
  0x2a   :  { %v143_v12 = vand.u32 4294901760, %v55_v9  ;;  %v57_v14 = vld [vmem:[#allocation5 + $0x30] sm:$0xff]  ;;  %v3298_v17 = vsub.f32 %v52_v1, %v137_v4  ;;  %v3302_v19 = vsub.f32 %v54_v3, %v1335_v7  ;;  %v64_v20 = vld [vmem:[#allocation5 + $0x68] sm:$0xff]  ;;  %v62_v21 = vld [vmem:[#allocation5 + $0x58] sm:$0xff]  ;;  %v1337_v29 = vand.u32 4294901760, %v53_v13 }
  0x2b   :  { %v3296_v16 = vpack.c.bf16 %v141_v5, %v137_v4  ;;  %v3300_v18 = vsub.f32 %v56_v2, %v141_v5  ;;  %v66_v22 = vld [vmem:[#allocation5 + $0x78] sm:$0xff]  ;;  %v3304_v23 = vpack.c.bf16 %v1339_v10, %v1335_v7  ;;  %v3306_v24 = vsub.f32 %v58_v6, %v1339_v10  ;;  %v59_v27 = vld [vmem:[#allocation5 + $0x40] sm:$0xff]  ;;  %v61_v37 = vld [vmem:[#allocation5 + $0x50] sm:$0xff] }
  0x2c   :  { %4664 = vst [vmem:[#allocation12_spill] sm:$0xff] %v3298_v17  ;;  %4666 = vst [vmem:[#allocation14_spill] sm:$0xff] %v3302_v19  ;;  %v3308_v25 = vpack.c.bf16 %v143_v12, %v139_v11  ;;  %v3310_v26 = vsub.f32 %v51_v8, %v139_v11  ;;  %v3313_v28 = vsub.f32 %v55_v9, %v143_v12  ;;  %v1341_v30 = vand.u32 4294901760, %v57_v14  ;;  %v63_v32 = vld [vmem:[#allocation5 + $0x60] sm:$0xff]  ;;  %v65_v38 = vld [vmem:[#allocation5 + $0x70] sm:$0xff] }
  0x2d   :  { %4663 = vst [vmem:[#allocation11_spill] sm:$0xff] %v3296_v16  ;;  %4665 = vst [vmem:[#allocation13_spill] sm:$0xff] %v3300_v18  ;;  %2584 = vmatprep.subr.bf16.mxu0 %v3296_v16  ;;  %v145_v31 = vand.u32 4294901760, %v60_v15  ;;  %2776 = vmatprep.subr.bf16.mxu1 %v3304_v23  ;;  %v149_v33 = vand.u32 4294901760, %v64_v20  ;;  %v1343_v34 = vand.u32 4294901760, %v62_v21  ;;  %v1347_v35 = vand.u32 4294901760, %v66_v22 }
  0x2e   :  { %4667 = vst [vmem:[#allocation15_spill] sm:$0xff] %v3304_v23  ;;  %4668 = vst [vmem:[#allocation16_spill] sm:$0xff] %v3306_v24  ;;  %2586 = vmatpush1.bf16.msra.mxu0 %v3308_v25  ;;  %v147_v36 = vand.u32 4294901760, %v59_v27  ;;  %v3317_v39 = vpack.c.bf16 %v1341_v30, %v1337_v29  ;;  %v3319_v40 = vsub.f32 %v53_v13, %v1337_v29  ;;  %v68_v43 = vld [vmem:[#allocation5 + $0x88] sm:$0xff]  ;;  %v70_v45 = vld [vmem:[#allocation5 + $0x98] sm:$0xff]  ;;  %v151_v52 = vand.u32 4294901760, %v63_v32 }
  0x2f   :  { %4669 = vst [vmem:[#allocation17_spill] sm:$0xff] %v3308_v25  ;;  %4670 = vst [vmem:[#allocation18_spill] sm:$0xff] %v3310_v26  ;;  %v3321_v41 = vsub.f32 %v57_v14, %v1341_v30  ;;  %v3323_v42 = vsub.f32 %v60_v15, %v145_v31  ;;  %v72_v44 = vld [vmem:[#allocation5 + $0xa8] sm:$0xff]  ;;  %v3325_v46 = vpack.c.bf16 %v149_v33, %v145_v31  ;;  %v74_v50 = vld [vmem:[#allocation5 + $0xb8] sm:$0xff]  ;;  %v1345_v54 = vand.u32 4294901760, %v61_v37 }
  0x30   :  { %4671 = vst [vmem:[#allocation19_spill] sm:$0xff] %v3313_v28  ;;  %4672 = vst [vmem:[#allocation20_spill] sm:$0xff] %v3317_v39  ;;  %v3327_v47 = vsub.f32 %v64_v20, %v149_v33  ;;  %v3329_v48 = vpack.c.bf16 %v1347_v35, %v1343_v34  ;;  %v3331_v49 = vsub.f32 %v62_v21, %v1343_v34  ;;  %2778 = vmatpush1.bf16.msra.mxu1 %v3317_v39  ;;  %v67_v59 = vld [vmem:[#allocation5 + $0x80] sm:$0xff]  ;;  %v69_v2 = vld [vmem:[#allocation5 + $0x90] sm:$0xff] }
  0x31   :  { %4673 = vst [vmem:[#allocation21_spill] sm:$0xff] %v3319_v40  ;;  %4674 = vst [vmem:[#allocation22_spill] sm:$0xff] %v3321_v41  ;;  %v3334_v51 = vsub.f32 %v66_v22, %v1347_v35  ;;  %v3336_v53 = vsub.f32 %v59_v27, %v147_v36  ;;  %2588 = vmatprep.subr.bf16.mxu0 %v3325_v46  ;;  %v1349_v55 = vand.u32 4294901760, %v65_v38  ;;  %v153_v56 = vand.u32 4294901760, %v68_v43  ;;  %v71_v60 = vld [vmem:[#allocation5 + $0xa0] sm:$0xff]  ;;  %v73_v3 = vld [vmem:[#allocation5 + $0xb0] sm:$0xff] }
  0x32   :  { %4675 = vst [vmem:[#allocation23_spill] sm:$0xff] %v3323_v42  ;;  %4676 = vst [vmem:[#allocation24_spill] sm:$0xff] %v3325_v46  ;;  %2780 = vmatprep.subr.bf16.mxu1 %v3329_v48  ;;  %v157_v57 = vand.u32 4294901760, %v72_v44  ;;  %v1351_v58 = vand.u32 4294901760, %v70_v45  ;;  %v3340_v61 = vpack.c.bf16 %v151_v52, %v147_v36  ;;  %v3342_v62 = vsub.f32 %v63_v32, %v151_v52  ;;  %v76_v4 = vld [vmem:[#allocation5 + $0xc8] sm:$0xff]  ;;  %v78_v10 = vld [vmem:[#allocation5 + $0xd8] sm:$0xff] }
  0x33   :  { %4677 = vst [vmem:[#allocation25_spill] sm:$0xff] %v3327_v47  ;;  %4678 = vst [vmem:[#allocation26_spill] sm:$0xff] %v3329_v48  ;;  %v3344_v63 = vsub.f32 %v61_v37, %v1345_v54  ;;  %v1355_v1 = vand.u32 4294901760, %v74_v50  ;;  %v3346_v5 = vpack.c.bf16 %v1349_v55, %v1345_v54  ;;  %v3348_v6 = vsub.f32 %v65_v38, %v1349_v55  ;;  %v80_v9 = vld [vmem:[#allocation5 + $0xe8] sm:$0xff]  ;;  %v82_v11 = vld [vmem:[#allocation5 + $0xf8] sm:$0xff] }
  0x34   :  { %4679 = vst [vmem:[#allocation27_spill] sm:$0xff] %v3331_v49  ;;  %4680 = vst [vmem:[#allocation28_spill] sm:$0xff] %v3334_v51  ;;  %v3350_v7 = vpack.c.bf16 %v157_v57, %v153_v56  ;;  %v3352_v8 = vsub.f32 %v68_v43, %v153_v56  ;;  %2590 = vmatpush1.bf16.msra.mxu0 %v3340_v61  ;;  %v3355_v12 = vsub.f32 %v72_v44, %v157_v57  ;;  %v75_v33 = vld [vmem:[#allocation5 + $0xc0] sm:$0xff]  ;;  %v77_v43 = vld [vmem:[#allocation5 + $0xd0] sm:$0xff] }
  0x35   :  { %4681 = vst [vmem:[#allocation29_spill] sm:$0xff] %v3336_v53  ;;  %4682 = vst [vmem:[#allocation30_spill] sm:$0xff] %v3340_v61  ;;  %v3357_v13 = vpack.c.bf16 %v1355_v1, %v1351_v58  ;;  %v3359_v14 = vsub.f32 %v70_v45, %v1351_v58  ;;  %v3361_v15 = vsub.f32 %v74_v50, %v1355_v1  ;;  %2782 = vmatpush1.bf16.msra.mxu1 %v3346_v5  ;;  %v79_v38 = vld [vmem:[#allocation5 + $0xe0] sm:$0xff]  ;;  %v81_v44 = vld [vmem:[#allocation5 + $0xf0] sm:$0xff] }
  0x36   :  { %4683 = vst [vmem:[#allocation31_spill] sm:$0xff] %v3342_v62  ;;  %4684 = vst [vmem:[#allocation32_spill] sm:$0xff] %v3346_v5  ;;  %2592 = vmatprep.subr.bf16.mxu0 %v3350_v7  ;;  %v155_v20 = vand.u32 4294901760, %v67_v59  ;;  %v159_v21 = vand.u32 4294901760, %v71_v60  ;;  %v1353_v22 = vand.u32 4294901760, %v69_v2  ;;  %v1357_v27 = vand.u32 4294901760, %v73_v3 }
  0x37   :  { %4685 = vst [vmem:[#allocation33_spill] sm:$0xff] %v3350_v7  ;;  %4686 = vst [vmem:[#allocation34_spill] sm:$0xff] %v3357_v13  ;;  %2784 = vmatprep.subr.bf16.mxu1 %v3357_v13  ;;  %v161_v29 = vand.u32 4294901760, %v76_v4  ;;  %v165_v30 = vand.u32 4294901760, %v80_v9  ;;  %v1359_v31 = vand.u32 4294901760, %v78_v10  ;;  %v1363_v32 = vand.u32 4294901760, %v82_v11 }
  0x38   :  { %v3366_v34 = vpack.c.bf16 %v159_v21, %v155_v20  ;;  %v3368_v35 = vsub.f32 %v67_v59, %v155_v20  ;;  %v3370_v36 = vsub.f32 %v71_v60, %v159_v21  ;;  %v3372_v37 = vpack.c.bf16 %v1357_v27, %v1353_v22  ;;  %v84_v55 = vld [vmem:[#allocation5 + $0x108] sm:$0xff]  ;;  %v86_v57 = vld [vmem:[#allocation5 + $0x118] sm:$0xff]  ;;  %v87_v0 = vld [vmem:[#allocation5 + $0x120] sm:$0xff] }
  0x39   :  { %v3374_v45 = vsub.f32 %v69_v2, %v1353_v22  ;;  %v3376_v50 = vsub.f32 %v73_v3, %v1357_v27  ;;  %v3378_v52 = vpack.c.bf16 %v165_v30, %v161_v29  ;;  %v3380_v54 = vsub.f32 %v76_v4, %v161_v29  ;;  %v88_v56 = vld [vmem:[#allocation5 + $0x128] sm:$0xff]  ;;  %v90_v21 = vld [vmem:[#allocation5 + $0x138] sm:$0xff]  ;;  %v93_v39 = vld [vmem:[#allocation5 + $0x150] sm:$0xff] }
  0x3a   :  { %4687 = vst [vmem:[#allocation35_spill] sm:$0xff] %v3366_v34  ;;  %4688 = vst [vmem:[#allocation36_spill] sm:$0xff] %v3372_v37  ;;  %2594 = vmatpush1.bf16.msra.mxu0 %v3366_v34  ;;  %2786 = vmatpush1.bf16.msra.mxu1 %v3372_v37  ;;  %v3384_v58 = vsub.f32 %v80_v9, %v165_v30  ;;  %v3386_v59 = vpack.c.bf16 %v1363_v32, %v1359_v31  ;;  %v163_v1 = vand.u32 4294901760, %v75_v33  ;;  %v83_v30 = vld [vmem:[#allocation5 + $0x100] sm:$0xff]  ;;  %v92_v34 = vld [vmem:[#allocation5 + $0x148] sm:$0xff] }
  0x3b   :  { %4689 = vst [vmem:[#allocation37_spill] sm:$0xff] %v3378_v52  ;;  %v3388_v60 = vsub.f32 %v78_v10, %v1359_v31  ;;  %2596 = vmatprep.subr.bf16.mxu0 %v3378_v52  ;;  %v3391_v2 = vsub.f32 %v82_v11, %v1363_v32  ;;  %v167_v3 = vand.u32 4294901760, %v79_v38  ;;  %v1361_v4 = vand.u32 4294901760, %v77_v43  ;;  %v85_v10 = vld [vmem:[#allocation5 + $0x110] sm:$0xff]  ;;  %v96_v13 = vld [vmem:[#allocation5 + $0x168] sm:$0xff]  ;;  %v94_v48 = vld [vmem:[#allocation5 + $0x158] sm:$0xff] }
  0x3c   :  { %4690 = vst [vmem:[#allocation38_spill] sm:$0xff] %v3386_v59  ;;  %v1365_v20 = vand.u32 4294901760, %v81_v44  ;;  %2788 = vmatprep.subr.bf16.mxu1 %v3386_v59  ;;  %v3394_v22 = vsub.f32 %v75_v33, %v163_v1  ;;  %v169_v27 = vand.u32 4294901760, %v84_v55  ;;  %v173_v9 = vand.u32 4294901760, %v88_v56  ;;  %v89_v52 = vld [vmem:[#allocation5 + $0x130] sm:$0xff] }
  0x3d   :  { %v1367_v29 = vand.u32 4294901760, %v86_v57  ;;  %v3396_v31 = vpack.c.bf16 %v167_v3, %v163_v1  ;;  %v3398_v37 = vsub.f32 %v79_v38, %v167_v3  ;;  %v3402_v32 = vsub.f32 %v77_v43, %v1361_v4  ;;  %v97_v16 = vld [vmem:[#allocation5 + $0x170] sm:$0xff] }
  0x3e   :  { %v3400_v11 = vpack.c.bf16 %v1365_v20, %v1361_v4  ;;  %v3404_v59 = vsub.f32 %v81_v44, %v1365_v20  ;;  %v3406_v33 = vpack.c.bf16 %v173_v9, %v169_v27  ;;  %v3408_v5 = vsub.f32 %v84_v55, %v169_v27  ;;  %v98_v55 = vld [vmem:[#allocation5 + $0x178] sm:$0xff] }
  0x3f   :  { %4691 = vst [vmem:[#allocation39_spill] sm:$0xff] %v3396_v31  ;;  %v3410_v7 = vsub.f32 %v88_v56, %v173_v9  ;;  %2598 = vmatpush1.bf16.msra.mxu0 %v3396_v31  ;;  %v1371_v38 = vand.u32 4294901760, %v90_v21  ;;  %v3414_v1 = vsub.f32 %v86_v57, %v1367_v29  ;;  %v171_v43 = vand.u32 4294901760, %v83_v30  ;;  %v91_v57 = vld [vmem:[#allocation5 + $0x140] sm:$0xff] }
  0x40   :  { %4692 = vst [vmem:[#allocation40_spill] sm:$0xff] %v3400_v11  ;;  %4693 = vst [vmem:[#allocation41_spill] sm:$0xff] %v3404_v59  ;;  %2790 = vmatpush1.bf16.msra.mxu1 %v3400_v11  ;;  %v175_v3 = vand.u32 4294901760, %v87_v0  ;;  %2600 = vmatprep.subr.bf16.mxu0 %v3406_v33  ;;  %v1369_v4 = vand.u32 4294901760, %v85_v10  ;;  %v1373_v44 = vand.u32 4294901760, %v89_v52  ;;  %v177_v20 = vand.u32 4294901760, %v92_v34 }
  0x41   :  { %4694 = vst [vmem:[#allocation42_spill] sm:$0xff] %v3406_v33  ;;  %4695 = vst [vmem:[#allocation43_spill] sm:$0xff] %v3408_v5  ;;  %v181_v61 = vand.u32 4294901760, %v96_v13  ;;  %v3417_v27 = vpack.c.bf16 %v1371_v38, %v1367_v29  ;;  %v3419_v56 = vsub.f32 %v90_v21, %v1371_v38  ;;  %v3423_v11 = vsub.f32 %v83_v30, %v171_v43  ;;  %v95_v31 = vld [vmem:[#allocation5 + $0x160] sm:$0xff]  ;;  %v100_v29 = vld [vmem:[#allocation5 + $0x188] sm:$0xff] }
  0x42   :  { %4696 = vst [vmem:[#allocation44_spill] sm:$0xff] %v3410_v7  ;;  %4697 = vst [vmem:[#allocation45_spill] sm:$0xff] %v3414_v1  ;;  %v3421_v9 = vpack.c.bf16 %v175_v3, %v171_v43  ;;  %v3425_v46 = vsub.f32 %v87_v0, %v175_v3  ;;  %v3427_v33 = vpack.c.bf16 %v1373_v44, %v1369_v4  ;;  %v104_v1 = vld [vmem:[#allocation5 + $0x1a8] sm:$0xff]  ;;  %v1375_v0 = vand.u32 4294901760, %v94_v48 }
  0x43   :  { %4698 = vst [vmem:[#allocation46_spill] sm:$0xff] %v3417_v27  ;;  %4699 = vst [vmem:[#allocation47_spill] sm:$0xff] %v3419_v56  ;;  %v3429_v25 = vsub.f32 %v85_v10, %v1369_v4  ;;  %v3431_v23 = vsub.f32 %v89_v52, %v1373_v44  ;;  %2792 = vmatprep.subr.bf16.mxu1 %v3417_v27  ;;  %v3435_v21 = vpack.c.bf16 %v181_v61, %v177_v20  ;;  %v112_v56 = vld [vmem:[#allocation5 + $0x1e8] sm:$0xff] }
  0x44   :  { %4700 = vst [vmem:[#allocation48_spill] sm:$0xff] %v3421_v9  ;;  %4701 = vst [vmem:[#allocation49_spill] sm:$0xff] %v3423_v11  ;;  %2602 = vmatpush1.bf16.msra.mxu0 %v3421_v9  ;;  %v3437_v30 = vsub.f32 %v92_v34, %v177_v20  ;;  %v3439_v38 = vsub.f32 %v96_v13, %v181_v61  ;;  %2794 = vmatpush1.bf16.msra.mxu1 %v3427_v33  ;;  %v1379_v10 = vand.u32 4294901760, %v98_v55  ;;  %v105_v11 = vld [vmem:[#allocation5 + $0x1b0] sm:$0xff] }
  0x45   :  { %4702 = vst [vmem:[#allocation50_spill] sm:$0xff] %v3425_v46  ;;  %4703 = vst [vmem:[#allocation51_spill] sm:$0xff] %v3427_v33  ;;  %v179_v43 = vand.u32 4294901760, %v91_v57  ;;  %v183_v52 = vand.u32 4294901760, %v95_v31  ;;  %v1377_v3 = vand.u32 4294901760, %v93_v39  ;;  %2604 = vmatprep.subr.bf16.mxu0 %v3435_v21  ;;  %v3443_v4 = vsub.f32 %v94_v48, %v1375_v0  ;;  %v99_v33 = vld [vmem:[#allocation5 + $0x180] sm:$0xff] }
  0x46   :  { %4704 = vst [vmem:[#allocation52_spill] sm:$0xff] %v3429_v25  ;;  %4705 = vst [vmem:[#allocation53_spill] sm:$0xff] %v3431_v23  ;;  %v1381_v44 = vand.u32 4294901760, %v97_v16  ;;  %v185_v27 = vand.u32 4294901760, %v100_v29  ;;  %v189_v9 = vand.u32 4294901760, %v104_v1  ;;  %v102_v23 = vld [vmem:[#allocation5 + $0x198] sm:$0xff]  ;;  %v3445_v34 = vpack.c.bf16 %v1379_v10, %v1375_v0 }
  0x47   :  { %4706 = vst [vmem:[#allocation54_spill] sm:$0xff] %v3435_v21  ;;  %4707 = vst [vmem:[#allocation55_spill] sm:$0xff] %v3437_v30  ;;  %v106_v25 = vld [vmem:[#allocation5 + $0x1b8] sm:$0xff]  ;;  %v3447_v61 = vsub.f32 %v98_v55, %v1379_v10  ;;  %v3449_v13 = vpack.c.bf16 %v183_v52, %v179_v43  ;;  %v3451_v20 = vsub.f32 %v91_v57, %v179_v43  ;;  %v101_v30 = vld [vmem:[#allocation5 + $0x190] sm:$0xff]  ;;  %v187_v43 = vand.u32 4294901760, %v99_v33 }
  0x48   :  { %4708 = vst [vmem:[#allocation56_spill] sm:$0xff] %v3439_v38  ;;  %4709 = vst [vmem:[#allocation57_spill] sm:$0xff] %v3443_v4  ;;  %v103_v38 = vld [vmem:[#allocation5 + $0x1a0] sm:$0xff]  ;;  %v3453_v46 = vsub.f32 %v95_v31, %v183_v52  ;;  %v3455_v48 = vpack.c.bf16 %v1381_v44, %v1377_v3  ;;  %v3457_v21 = vsub.f32 %v93_v39, %v1377_v3  ;;  %v108_v0 = vld [vmem:[#allocation5 + $0x1c8] sm:$0xff]  ;;  %2796 = vmatprep.subr.bf16.mxu1 %v3445_v34 }
  0x49   :  { %4710 = vst [vmem:[#allocation58_spill] sm:$0xff] %v3445_v34  ;;  %4711 = vst [vmem:[#allocation59_spill] sm:$0xff] %v3447_v61  ;;  %v3459_v4 = vsub.f32 %v97_v16, %v1381_v44  ;;  %2606 = vmatpush1.bf16.msra.mxu0 %v3449_v13  ;;  %v3463_v55 = vpack.c.bf16 %v189_v9, %v185_v27  ;;  %v3465_v57 = vsub.f32 %v100_v29, %v185_v27 }
  0x4a   :  { %4712 = vst [vmem:[#allocation60_spill] sm:$0xff] %v3449_v13  ;;  %4713 = vst [vmem:[#allocation61_spill] sm:$0xff] %v3451_v20  ;;  %v3467_v10 = vsub.f32 %v104_v1, %v189_v9  ;;  %v1383_v31 = vand.u32 4294901760, %v102_v23  ;;  %2798 = vmatpush1.bf16.msra.mxu1 %v3455_v48  ;;  %v1387_v39 = vand.u32 4294901760, %v106_v25  ;;  %v191_v16 = vand.u32 4294901760, %v103_v38  ;;  %v113_v20 = vld [vmem:[#allocation5 + $0x1f0] sm:$0xff] }
  0x4b   :  { %4714 = vst [vmem:[#allocation62_spill] sm:$0xff] %v3453_v46  ;;  %4715 = vst [vmem:[#allocation63_spill] sm:$0xff] %v3455_v48  ;;  %v1385_v52 = vand.u32 4294901760, %v101_v30  ;;  %2608 = vmatprep.subr.bf16.mxu0 %v3463_v55  ;;  %v1389_v44 = vand.u32 4294901760, %v105_v11  ;;  %v193_v34 = vand.u32 4294901760, %v108_v0  ;;  %v197_v13 = vand.u32 4294901760, %v112_v56 }
  0x4c   :  { %4716 = vst [vmem:[#allocation64_spill] sm:$0xff] %v3457_v21  ;;  %4717 = vst [vmem:[#allocation65_spill] sm:$0xff] %v3459_v4  ;;  %v3471_v3 = vsub.f32 %v102_v23, %v1383_v31  ;;  %v110_v4 = vld [vmem:[#allocation5 + $0x1d8] sm:$0xff]  ;;  %v3473_v27 = vpack.c.bf16 %v1387_v39, %v1383_v31  ;;  %v3475_v1 = vsub.f32 %v106_v25, %v1387_v39  ;;  %v107_v48 = vld [vmem:[#allocation5 + $0x1c0] sm:$0xff] }
  0x4d   :  { %4718 = vst [vmem:[#allocation66_spill] sm:$0xff] %v3463_v55  ;;  %4719 = vst [vmem:[#allocation67_spill] sm:$0xff] %v3465_v57  ;;  %v114_v21 = vld [vmem:[#allocation5 + $0x1f8] sm:$0xff]  ;;  %v3477_v9 = vpack.c.bf16 %v191_v16, %v187_v43  ;;  %v3479_v29 = vsub.f32 %v99_v33, %v187_v43  ;;  %v109_v57 = vld [vmem:[#allocation5 + $0x1d0] sm:$0xff]  ;;  %v3481_v46 = vsub.f32 %v103_v38, %v191_v16  ;;  %v1391_v38 = vand.u32 4294901760, %v110_v4 }
  0x4e   :  { %4720 = vst [vmem:[#allocation68_spill] sm:$0xff] %v3467_v10  ;;  %4721 = vst [vmem:[#allocation69_spill] sm:$0xff] %v3471_v3  ;;  %v111_v10 = vld [vmem:[#allocation5 + $0x1e0] sm:$0xff]  ;;  %v3483_v23 = vpack.c.bf16 %v1389_v44, %v1385_v52  ;;  %v3485_v55 = vsub.f32 %v101_v30, %v1385_v52  ;;  %v3487_v3 = vsub.f32 %v105_v11, %v1389_v44  ;;  %2800 = vmatprep.subr.bf16.mxu1 %v3473_v27 }
  0x4f   :  { %4722 = vst [vmem:[#allocation70_spill] sm:$0xff] %v3473_v27  ;;  %4723 = vst [vmem:[#allocation71_spill] sm:$0xff] %v3475_v1  ;;  %v43_v31 = vld [vmem:[#allocation2] sm:$0xff]  ;;  %2610 = vmatpush1.bf16.msra.mxu0 %v3477_v9  ;;  %v3491_v25 = vpack.c.bf16 %v197_v13, %v193_v34  ;;  %v3493_v33 = vsub.f32 %v108_v0, %v193_v34  ;;  %v3495_v39 = vsub.f32 %v112_v56, %v197_v13 }
  0x50   :  { %4724 = vst [vmem:[#allocation72_spill] sm:$0xff] %v3477_v9  ;;  %4725 = vst [vmem:[#allocation73_spill] sm:$0xff] %v3483_v23  ;;  %2802 = vmatpush1.bf16.msra.mxu1 %v3483_v23  ;;  %v1395_v43 = vand.u32 4294901760, %v114_v21  ;;  %v195_v30 = vand.u32 4294901760, %v107_v48  ;;  %v199_v16 = vand.u32 4294901760, %v111_v10  ;;  %v1393_v11 = vand.u32 4294901760, %v109_v57 }
  0x51   :  { %4726 = vst [vmem:[#allocation74_spill] sm:$0xff] %v3491_v25  ;;  %4727 = vst [vmem:[#allocation75_spill] sm:$0xff] %v3495_v39  ;;  %2612 = vmatprep.subr.bf16.mxu0 %v3491_v25  ;;  %v3499_v52 = vsub.f32 %v110_v4, %v1391_v38  ;;  %v1397_v44 = vand.u32 4294901760, %v113_v20  ;;  %v3501_v27 = vand.u32 4294901760, %v43_v31  ;;  %v4500_v9 = vand.u32 4294901760, %v3298_v17 }
  0x52   :  { %v3504_v34 = vpack.c.bf16 %v1395_v43, %v1391_v38  ;;  %v3506_v56 = vsub.f32 %v114_v21, %v1395_v43  ;;  %v3508_v13 = vpack.c.bf16 %v199_v16, %v195_v30  ;;  %v3510_v0 = vsub.f32 %v107_v48, %v195_v30 }
  0x53   :  { %4728 = vst [vmem:[#allocation76_spill] sm:$0xff] %v3501_v27  ;;  %v3512_v23 = vsub.f32 %v111_v10, %v199_v16  ;;  %v3514_v39 = vpack.c.bf16 %v1397_v44, %v1393_v11  ;;  %v3516_v25 = vsub.f32 %v109_v57, %v1393_v11  ;;  %v3518_v4 = vsub.f32 %v113_v20, %v1397_v44 }
  0x54   :  { %4729 = vst [vmem:[#allocation77_spill] sm:$0xff] %v3504_v34  ;;  %4730 = vst [vmem:[#allocation78_spill] sm:$0xff] %v3508_v13  ;;  %2804 = vmatprep.subr.bf16.mxu1 %v3504_v34  ;;  %2614 = vmatpush1.bf16.msra.mxu0 %v3508_v13  ;;  %v3523_v38 = vsub.f32 %v43_v31, %v3501_v27  ;;  %v325_v21 = vsub.f32 %v3298_v17, %v4500_v9  ;;  %v4503_v48 = vand.u32 4294901760, %v3300_v18  ;;  %v44_v13 = vld [vmem:[#allocation2 + $0x8] sm:$0xff] }
  0x55   :  { %4731 = vst [vmem:[#allocation79_spill] sm:$0xff] %v3514_v39  ;;  %v4506_v10 = vand.u32 4294901760, %v3302_v19  ;;  %2806 = vmatpush1.bf16.msra.mxu1 %v3514_v39  ;;  %v4511_v20 = vand.u32 4294901760, %v3306_v24  ;;  %v4518_v57 = vand.u32 4294901760, %v3310_v26  ;;  %v4523_v43 = vand.u32 4294901760, %v3313_v28 }
  0x56   :  { %4732 = vst [vmem:[#allocation80_spill] sm:$0xff] %v3523_v38  ;;  %v3536_v31 = vand.u32 4294901760, %v3523_v38  ;;  %v326_v16 = vand.u32 4294901760, %v325_v21  ;;  %v337_v11 = vsub.f32 %v3300_v18, %v4503_v48  ;;  %v4734_v39 = vand.u32 4294901760, %v3319_v40 }
  0x57   :  { %v1523_v44 = vsub.f32 %v3302_v19, %v4506_v10  ;;  %v1535_v9 = vsub.f32 %v3306_v24, %v4511_v20  ;;  %v331_v30 = vsub.f32 %v3310_v26, %v4518_v57  ;;  %v343_v21 = vsub.f32 %v3313_v28, %v4523_v43 }
  0x58   :  { %4733 = vst [vmem:[#allocation81_spill] sm:$0xff] %v3536_v31  ;;  %v1529_v48 = vsub.f32 %v3319_v40, %v4734_v39  ;;  %v237_v10 = vsub.f32 %v3523_v38, %v3536_v31  ;;  %v338_v34 = vand.u32 4294901760, %v337_v11  ;;  %v4532_v20 = vand.u32 4294901760, %v3321_v41 }
  0x59   :  { %v1524_v27 = vand.u32 4294901760, %v1523_v44  ;;  %v1536_v24 = vand.u32 4294901760, %v1535_v9  ;;  %v332_v19 = vand.u32 4294901760, %v331_v30  ;;  %v344_v18 = vand.u32 4294901760, %v343_v21  ;;  %v45_v21 = vld [vmem:[#allocation2 + $0x10] sm:$0xff] }
  0x5a   :  { %v1530_v57 = vand.u32 4294901760, %v1529_v48  ;;  %v238_v26 = vand.u32 4294901760, %v237_v10  ;;  %v2615_v17 = vpack.c.bf16 %v338_v34, %v326_v16  ;;  %v1541_v43 = vsub.f32 %v3321_v41, %v4532_v20 }
  0x5b   :  { %v3562_v28 = vand.u32 4294901760, %v44_v13  ;;  %v2807_v39 = vpack.c.bf16 %v1536_v24, %v1524_v27  ;;  %v2617_v40 = vpack.c.bf16 %v344_v18, %v332_v19  ;;  %v4534_v31 = vand.u32 4294901760, %v3323_v42 }
  0x5c   :  { %v4533_v11 = vand.u32 4294901760, %v3327_v47  ;;  %239 = vmatmul.mubr.f32.vlgmr.msra.gmra.mrb[0].mxu0 %v238_v26  ;;  %2616 = vmatprep.subr.bf16.mxu0 %v2615_v17  ;;  %v1542_v9 = vand.u32 4294901760, %v1541_v43  ;;  %v4530_v34 = vand.u32 4294901760, %v3331_v49  ;;  %v4531_v48 = vand.u32 4294901760, %v3334_v51 }
  0x5d   :  { %4735 = vst [vmem:[#allocation82_spill] sm:$0xff] %v3562_v28  ;;  %v3567_v30 = vsub.f32 %v44_v13, %v3562_v28  ;;  %1437 = vmatmul.mubr.f32.vlgmr.msra.gmra.mrb[0].mxu1 %v238_v26  ;;  %2808 = vmatprep.subr.bf16.mxu1 %v2807_v39  ;;  %v349_v18 = vsub.f32 %v3323_v42, %v4534_v31  ;;  %v4535_v17 = vand.u32 4294901760, %v3336_v53  ;;  %v4536_v24 = vand.u32 4294901760, %v3342_v62 }
  0x5e   :  { %v361_v19 = vsub.f32 %v3327_v47, %v4533_v11  ;;  %2618 = vmatpush1.bf16.msra.mxu0 %v2617_v40  ;;  %v2809_v27 = vpack.c.bf16 %v1542_v9, %v1530_v57  ;;  %v4737_v13 = vmov 0.0   ;;  %v1547_v26 = vsub.f32 %v3331_v49, %v4530_v34 }
  0x5f   :  { %4736 = vst [vmem:[#allocation83_spill] sm:$0xff] %v3567_v30  ;;  %244 = vmatprep.mubr.f32.mxu0 %v4737_v13  ;;  %v3581_v10 = vand.u32 4294901760, %v3567_v30  ;;  %v1559_v43 = vsub.f32 %v3334_v51, %v4531_v48  ;;  %1442 = vmatprep.mubr.f32.mxu1 %v4737_v13  ;;  %v350_v16 = vand.u32 4294901760, %v349_v18  ;;  %v355_v40 = vsub.f32 %v3336_v53, %v4535_v17 }
  0x60   :  { %v362_v44 = vand.u32 4294901760, %v361_v19  ;;  %v367_v57 = vsub.f32 %v3342_v62, %v4536_v24  ;;  %2810 = vmatpush1.bf16.msra.mxu1 %v2809_v27  ;;  %v1548_v9 = vand.u32 4294901760, %v1547_v26  ;;  %v4542_v48 = vand.u32 4294901760, %v3344_v63 }
  0x61   :  { %4738 = vst [vmem:[#allocation84_spill] sm:$0xff] %v3581_v10  ;;  %v248_v39 = vsub.f32 %v3567_v30, %v3581_v10  ;;  %v1560_v34 = vand.u32 4294901760, %v1559_v43  ;;  %v356_v18 = vand.u32 4294901760, %v355_v40  ;;  %v4541_v11 = vand.u32 4294901760, %v3348_v6 }
  0x62   :  { %v2619_v20 = vpack.c.bf16 %v362_v44, %v350_v16  ;;  %v368_v19 = vand.u32 4294901760, %v367_v57  ;;  %v1553_v24 = vsub.f32 %v3344_v63, %v4542_v48  ;;  %v3603_v38 = vand.u32 4294901760, %v45_v21 }
  0x63   :  { %v249_v31 = vand.u32 4294901760, %v248_v39  ;;  %v2811_v17 = vpack.c.bf16 %v1560_v34, %v1548_v9  ;;  %v1565_v26 = vsub.f32 %v3348_v6, %v4541_v11  ;;  %v4540_v43 = vand.u32 4294901760, %v3352_v8 }
  0x64   :  { %4739 = vst [vmem:[#allocation85_spill] sm:$0xff] %v3603_v38  ;;  %2620 = vmatprep.subr.bf16.mxu0 %v2619_v20  ;;  %v2621_v27 = vpack.c.bf16 %v368_v19, %v356_v18  ;;  %v4539_v16 = vand.u32 4294901760, %v3355_v12  ;;  %v1554_v44 = vand.u32 4294901760, %v1553_v24  ;;  %v3611_v34 = vsub.f32 %v45_v21, %v3603_v38 }
  0x65   :  { %250 = vmatmul.mubr.f32.gmra.mrb[2].mxu0 %v249_v31  ;;  %1448 = vmatmul.mubr.f32.gmra.mrb[2].mxu1 %v249_v31  ;;  %v4545_v40 = vand.u32 4294901760, %v3359_v14  ;;  %v4546_v57 = vand.u32 4294901760, %v3361_v15  ;;  %v1566_v20 = vand.u32 4294901760, %v1565_v26  ;;  %v373_v39 = vsub.f32 %v3352_v8, %v4540_v43  ;;  %v46_v43 = vld [vmem:[#allocation2 + $0x18] sm:$0xff] }
  0x66   :  { %4740 = vst [vmem:[#allocation86_spill] sm:$0xff] %v3611_v34  ;;  %2812 = vmatprep.subr.bf16.mxu1 %v2811_v17  ;;  %2622 = vmatpush1.bf16.msra.mxu0 %v2621_v27  ;;  %v385_v9 = vsub.f32 %v3355_v12, %v4539_v16  ;;  %v4549_v31 = vand.u32 4294901760, %v3368_v35  ;;  %v3625_v24 = vand.u32 4294901760, %v3611_v34  ;;  %v4556_v18 = vand.u32 4294901760, %v3370_v36 }
  0x67   :  { %255 = vmatprep.mubr.f32.mxu0 %v4737_v13  ;;  %1453 = vmatprep.mubr.f32.mxu1 %v4737_v13  ;;  %v1571_v17 = vsub.f32 %v3359_v14, %v4545_v40  ;;  %v1583_v21 = vsub.f32 %v3361_v15, %v4546_v57  ;;  %v2813_v19 = vpack.c.bf16 %v1566_v20, %v1554_v44  ;;  %v374_v27 = vand.u32 4294901760, %v373_v39 }
  0x68   :  { %4741 = vst [vmem:[#allocation87_spill] sm:$0xff] %v3625_v24  ;;  %v386_v26 = vand.u32 4294901760, %v385_v9  ;;  %v379_v16 = vsub.f32 %v3368_v35, %v4549_v31  ;;  %v259_v11 = vsub.f32 %v3611_v34, %v3625_v24  ;;  %v391_v40 = vsub.f32 %v3370_v36, %v4556_v18 }
  0x69   :  { %v1572_v48 = vand.u32 4294901760, %v1571_v17  ;;  %v1584_v10 = vand.u32 4294901760, %v1583_v21  ;;  %2814 = vmatpush1.bf16.msra.mxu1 %v2813_v19  ;;  %v4555_v44 = vand.u32 4294901760, %v3374_v45  ;;  %v4554_v20 = vand.u32 4294901760, %v3376_v50 }
  0x6a   :  { %v2623_v57 = vpack.c.bf16 %v386_v26, %v374_v27  ;;  %v380_v30 = vand.u32 4294901760, %v379_v16  ;;  %v260_v39 = vand.u32 4294901760, %v259_v11  ;;  %v392_v31 = vand.u32 4294901760, %v391_v40 }
  0x6b   :  { %v2815_v9 = vpack.c.bf16 %v1584_v10, %v1572_v48  ;;  %v3644_v38 = vand.u32 4294901760, %v46_v43  ;;  %v1577_v17 = vsub.f32 %v3374_v45, %v4555_v44  ;;  %v1589_v21 = vsub.f32 %v3376_v50, %v4554_v20 }
  0x6c   :  { %2624 = vmatprep.subr.bf16.mxu0 %v2623_v57  ;;  %v4552_v16 = vand.u32 4294901760, %v3380_v54  ;;  %v4553_v19 = vand.u32 4294901760, %v3384_v58  ;;  %261 = vmatmul.mubr.f32.gmra.mrb[4].mxu0 %v260_v39  ;;  %v2625_v11 = vpack.c.bf16 %v392_v31, %v380_v30  ;;  %v4557_v10 = vand.u32 4294901760, %v3388_v60 }
  0x6d   :  { %4742 = vst [vmem:[#allocation88_spill] sm:$0xff] %v3644_v38  ;;  %1459 = vmatmul.mubr.f32.gmra.mrb[4].mxu1 %v260_v39  ;;  %v3655_v48 = vsub.f32 %v46_v43, %v3644_v38  ;;  %v4560_v40 = vand.u32 4294901760, %v3391_v2  ;;  %2816 = vmatprep.subr.bf16.mxu1 %v2815_v9  ;;  %v1578_v57 = vand.u32 4294901760, %v1577_v17  ;;  %v1590_v27 = vand.u32 4294901760, %v1589_v21 }
  0x6e   :  { %266 = vmatprep.mubr.f32.mxu0 %v4737_v13  ;;  %v397_v26 = vsub.f32 %v3380_v54, %v4552_v16  ;;  %v409_v30 = vsub.f32 %v3384_v58, %v4553_v19  ;;  %2626 = vmatpush1.bf16.msra.mxu0 %v2625_v11  ;;  %v1595_v31 = vsub.f32 %v3388_v60, %v4557_v10  ;;  %v4569_v9 = vand.u32 4294901760, %v3394_v22  ;;  %v47_v19 = vld [vmem:[#allocation2 + $0x20] sm:$0xff] }
  0x6f   :  { %4743 = vst [vmem:[#allocation89_spill] sm:$0xff] %v3655_v48  ;;  %1464 = vmatprep.mubr.f32.mxu1 %v4737_v13  ;;  %v3668_v43 = vand.u32 4294901760, %v3655_v48  ;;  %v1607_v39 = vsub.f32 %v3391_v2, %v4560_v40  ;;  %v2817_v17 = vpack.c.bf16 %v1590_v27, %v1578_v57  ;;  %v4566_v11 = vand.u32 4294901760, %v3398_v37 }
  0x70   :  { %v398_v21 = vand.u32 4294901760, %v397_v26  ;;  %v410_v16 = vand.u32 4294901760, %v409_v30  ;;  %v1596_v44 = vand.u32 4294901760, %v1595_v31  ;;  %v403_v10 = vsub.f32 %v3394_v22, %v4569_v9  ;;  %v4751_v9 = vld [vmem:[#allocation50_spill] sm:$0xff] }
  0x71   :  { %4744 = vst [vmem:[#allocation90_spill] sm:$0xff] %v3668_v43  ;;  %v270_v20 = vsub.f32 %v3655_v48, %v3668_v43  ;;  %v1608_v18 = vand.u32 4294901760, %v1607_v39  ;;  %2818 = vmatpush1.bf16.msra.mxu1 %v2817_v17  ;;  %v415_v57 = vsub.f32 %v3398_v37, %v4566_v11  ;;  %v4565_v27 = vand.u32 4294901760, %v3402_v32 }
  0x72   :  { %v2627_v24 = vpack.c.bf16 %v410_v16, %v398_v21  ;;  %v4567_v26 = vand.u32 4294901760, %v3404_v59  ;;  %v404_v34 = vand.u32 4294901760, %v403_v10  ;;  %v3688_v43 = vand.u32 4294901760, %v47_v19  ;;  %v4748_v10 = vld [vmem:[#allocation47_spill] sm:$0xff] }
  0x73   :  { %v271_v30 = vand.u32 4294901760, %v270_v20  ;;  %v2819_v40 = vpack.c.bf16 %v1608_v18, %v1596_v44  ;;  %v416_v31 = vand.u32 4294901760, %v415_v57  ;;  %v1601_v39 = vsub.f32 %v3402_v32, %v4565_v27  ;;  %v4747_v44 = vld [vmem:[#allocation45_spill] sm:$0xff] }
  0x74   :  { %4745 = vst [vmem:[#allocation91_spill] sm:$0xff] %v3688_v43  ;;  %2628 = vmatprep.subr.bf16.mxu0 %v2627_v24  ;;  %v1613_v16 = vsub.f32 %v3404_v59, %v4567_v26  ;;  %v4568_v17 = vand.u32 4294901760, %v3408_v5  ;;  %v3698_v20 = vsub.f32 %v47_v19, %v3688_v43  ;;  %v4576_v18 = vand.u32 4294901760, %v3410_v7  ;;  %v48_v43 = vld [vmem:[#allocation2 + $0x28] sm:$0xff] }
  0x75   :  { %272 = vmatmul.mubr.f32.gmra.mrb[6].mxu0 %v271_v30  ;;  %1470 = vmatmul.mubr.f32.gmra.mrb[6].mxu1 %v271_v30  ;;  %v4581_v24 = vand.u32 4294901760, %v4747_v44  ;;  %v4582_v21 = vand.u32 4294901760, %v4748_v10  ;;  %v2629_v57 = vpack.c.bf16 %v416_v31, %v404_v34  ;;  %v1602_v27 = vand.u32 4294901760, %v1601_v39 }
  0x76   :  { %4746 = vst [vmem:[#allocation92_spill] sm:$0xff] %v3698_v20  ;;  %2820 = vmatprep.subr.bf16.mxu1 %v2819_v40  ;;  %v1614_v11 = vand.u32 4294901760, %v1613_v16  ;;  %277 = vmatprep.mubr.f32.mxu0 %v4737_v13  ;;  %v421_v26 = vsub.f32 %v3408_v5, %v4568_v17  ;;  %v3709_v19 = vand.u32 4294901760, %v3698_v20  ;;  %v433_v30 = vsub.f32 %v3410_v7, %v4576_v18  ;;  %v4750_v16 = vld [vmem:[#allocation49_spill] sm:$0xff] }
  0x77   :  { %1475 = vmatprep.mubr.f32.mxu1 %v4737_v13  ;;  %v1619_v34 = vsub.f32 %v4747_v44, %v4581_v24  ;;  %v1631_v40 = vsub.f32 %v4748_v10, %v4582_v21  ;;  %2630 = vmatpush1.bf16.msra.mxu0 %v2629_v57  ;;  %v4590_v17 = vand.u32 4294901760, %v4750_v16  ;;  %v4589_v48 = vand.u32 4294901760, %v4751_v9  ;;  %v4753_v57 = vld [vmem:[#allocation53_spill] sm:$0xff] }
  0x78   :  { %4749 = vst [vmem:[#allocation93_spill] sm:$0xff] %v3709_v19  ;;  %v2821_v31 = vpack.c.bf16 %v1614_v11, %v1602_v27  ;;  %v422_v39 = vand.u32 4294901760, %v421_v26  ;;  %v281_v38 = vsub.f32 %v3698_v20, %v3709_v19  ;;  %v434_v18 = vand.u32 4294901760, %v433_v30  ;;  %v4752_v27 = vld [vmem:[#allocation52_spill] sm:$0xff] }
  0x79   :  { %v1620_v7 = vand.u32 4294901760, %v1619_v34  ;;  %v1632_v5 = vand.u32 4294901760, %v1631_v40  ;;  %v427_v24 = vsub.f32 %v4750_v16, %v4590_v17  ;;  %v439_v11 = vsub.f32 %v4751_v9, %v4589_v48 }
  0x7a   :  { %2822 = vmatpush1.bf16.msra.mxu1 %v2821_v31  ;;  %v4591_v26 = vand.u32 4294901760, %v4752_v27  ;;  %v4594_v21 = vand.u32 4294901760, %v4753_v57  ;;  %v282_v10 = vand.u32 4294901760, %v281_v38  ;;  %v2631_v44 = vpack.c.bf16 %v434_v18, %v422_v39  ;;  %v4756_v38 = vld [vmem:[#allocation55_spill] sm:$0xff]  ;;  %v4758_v39 = vld [vmem:[#allocation57_spill] sm:$0xff] }
  0x7b   :  { %v2823_v59 = vpack.c.bf16 %v1632_v5, %v1620_v7  ;;  %v3732_v19 = vand.u32 4294901760, %v48_v43  ;;  %v428_v30 = vand.u32 4294901760, %v427_v24  ;;  %v440_v34 = vand.u32 4294901760, %v439_v11  ;;  %v4757_v5 = vld [vmem:[#allocation56_spill] sm:$0xff] }
  0x7c   :  { %v1625_v40 = vsub.f32 %v4752_v27, %v4591_v26  ;;  %v1637_v31 = vsub.f32 %v4753_v57, %v4594_v21  ;;  %283 = vmatmul.mubr.f32.gmra.mrb[8].mxu0 %v282_v10  ;;  %2632 = vmatprep.subr.bf16.mxu0 %v2631_v44  ;;  %v4598_v18 = vand.u32 4294901760, %v4756_v38  ;;  %v4600_v7 = vand.u32 4294901760, %v4757_v5  ;;  %v4761_v21 = vld [vmem:[#allocation62_spill] sm:$0xff]  ;;  %v49_v57 = vld [vmem:[#allocation2 + $0x30] sm:$0xff] }
  0x7d   :  { %4754 = vst [vmem:[#allocation49_spill] sm:$0xff] %v3732_v19  ;;  %v3741_v48 = vsub.f32 %v48_v43, %v3732_v19  ;;  %v4604_v24 = vand.u32 4294901760, %v4758_v39  ;;  %1481 = vmatmul.mubr.f32.gmra.mrb[8].mxu1 %v282_v10  ;;  %2824 = vmatprep.subr.bf16.mxu1 %v2823_v59  ;;  %v2633_v11 = vpack.c.bf16 %v440_v34, %v428_v30  ;;  %v4603_v20 = vand.u32 4294901760, %v3447_v61 }
  0x7e   :  { %v1626_v17 = vand.u32 4294901760, %v1625_v40  ;;  %v1638_v26 = vand.u32 4294901760, %v1637_v31  ;;  %288 = vmatprep.mubr.f32.mxu0 %v4737_v13  ;;  %1486 = vmatprep.mubr.f32.mxu1 %v4737_v13  ;;  %v445_v44 = vsub.f32 %v4756_v38, %v4598_v18  ;;  %v457_v59 = vsub.f32 %v4757_v5, %v4600_v7  ;;  %v4760_v40 = vld [vmem:[#allocation61_spill] sm:$0xff] }
  0x7f   :  { %4755 = vst [vmem:[#allocation94_spill] sm:$0xff] %v3741_v48  ;;  %v3750_v43 = vand.u32 4294901760, %v3741_v48  ;;  %v1643_v10 = vsub.f32 %v4758_v39, %v4604_v24  ;;  %2634 = vmatpush1.bf16.msra.mxu0 %v2633_v11  ;;  %v1655_v34 = vsub.f32 %v3447_v61, %v4603_v20  ;;  %v4612_v31 = vand.u32 4294901760, %v4760_v40  ;;  %v4762_v11 = vld [vmem:[#allocation64_spill] sm:$0xff]  ;;  %v4763_v39 = vld [vmem:[#allocation65_spill] sm:$0xff] }
  0x80   :  { %v2825_v30 = vpack.c.bf16 %v1638_v26, %v1626_v17  ;;  %v4611_v19 = vand.u32 4294901760, %v4761_v21  ;;  %v446_v38 = vand.u32 4294901760, %v445_v44  ;;  %v458_v7 = vand.u32 4294901760, %v457_v59 }
  0x81   :  { %4759 = vst [vmem:[#allocation95_spill] sm:$0xff] %v3750_v43  ;;  %v292_v18 = vsub.f32 %v3741_v48, %v3750_v43  ;;  %v1644_v5 = vand.u32 4294901760, %v1643_v10  ;;  %v1656_v27 = vand.u32 4294901760, %v1655_v34  ;;  %v451_v17 = vsub.f32 %v4760_v40, %v4612_v31 }
  0x82   :  { %2826 = vmatpush1.bf16.msra.mxu1 %v2825_v30  ;;  %v463_v26 = vsub.f32 %v4761_v21, %v4611_v19  ;;  %v4613_v20 = vand.u32 4294901760, %v4762_v11  ;;  %v2635_v61 = vpack.c.bf16 %v458_v7, %v446_v38  ;;  %v4614_v9 = vand.u32 4294901760, %v4763_v39  ;;  %v4766_v38 = vld [vmem:[#allocation67_spill] sm:$0xff]  ;;  %v4767_v19 = vld [vmem:[#allocation68_spill] sm:$0xff] }
  0x83   :  { %v293_v24 = vand.u32 4294901760, %v292_v18  ;;  %v3776_v43 = vand.u32 4294901760, %v49_v57  ;;  %v2827_v44 = vpack.c.bf16 %v1656_v27, %v1644_v5  ;;  %v452_v59 = vand.u32 4294901760, %v451_v17  ;;  %v4768_v17 = vld [vmem:[#allocation69_spill] sm:$0xff] }
  0x84   :  { %v464_v10 = vand.u32 4294901760, %v463_v26  ;;  %v1649_v30 = vsub.f32 %v4762_v11, %v4613_v20  ;;  %2636 = vmatprep.subr.bf16.mxu0 %v2635_v61  ;;  %v1661_v34 = vsub.f32 %v4763_v39, %v4614_v9  ;;  %v4615_v7 = vand.u32 4294901760, %v4766_v38 }
  0x85   :  { %4764 = vst [vmem:[#allocation61_spill] sm:$0xff] %v3776_v43  ;;  %294 = vmatmul.mubr.f32.gmra.mrb[10].mxu0 %v293_v24  ;;  %v3785_v18 = vsub.f32 %v49_v57, %v3776_v43  ;;  %v4620_v31 = vand.u32 4294901760, %v4767_v19  ;;  %1492 = vmatmul.mubr.f32.gmra.mrb[10].mxu1 %v293_v24  ;;  %v4622_v26 = vand.u32 4294901760, %v4768_v17  ;;  %v4623_v20 = vand.u32 4294901760, %v3475_v1 }
  0x86   :  { %2828 = vmatprep.subr.bf16.mxu1 %v2827_v44  ;;  %v2637_v27 = vpack.c.bf16 %v464_v10, %v452_v59  ;;  %v1650_v5 = vand.u32 4294901760, %v1649_v30  ;;  %v1662_v61 = vand.u32 4294901760, %v1661_v34  ;;  %299 = vmatprep.mubr.f32.mxu0 %v4737_v13  ;;  %v469_v9 = vsub.f32 %v4766_v38, %v4615_v7 }
  0x87   :  { %4765 = vst [vmem:[#allocation62_spill] sm:$0xff] %v3785_v18  ;;  %1497 = vmatprep.mubr.f32.mxu1 %v4737_v13  ;;  %v3794_v57 = vand.u32 4294901760, %v3785_v18  ;;  %v481_v24 = vsub.f32 %v4767_v19, %v4620_v31  ;;  %v1667_v44 = vsub.f32 %v4768_v17, %v4622_v26  ;;  %v1679_v59 = vsub.f32 %v3475_v1, %v4623_v20  ;;  %v50_v31 = vld [vmem:[#allocation2 + $0x38] sm:$0xff] }
  0x88   :  { %2638 = vmatpush1.bf16.msra.mxu0 %v2637_v27  ;;  %v4634_v10 = vand.u32 4294901760, %v3479_v29  ;;  %v4632_v30 = vand.u32 4294901760, %v3481_v46  ;;  %v2829_v34 = vpack.c.bf16 %v1662_v61, %v1650_v5  ;;  %v470_v48 = vand.u32 4294901760, %v469_v9 }
  0x89   :  { %4769 = vst [vmem:[#allocation64_spill] sm:$0xff] %v3794_v57  ;;  %v303_v7 = vsub.f32 %v3785_v18, %v3794_v57  ;;  %v482_v43 = vand.u32 4294901760, %v481_v24  ;;  %v1668_v27 = vand.u32 4294901760, %v1667_v44  ;;  %v1680_v19 = vand.u32 4294901760, %v1679_v59 }
  0x8a   :  { %v475_v26 = vsub.f32 %v3479_v29, %v4634_v10  ;;  %v487_v20 = vsub.f32 %v3481_v46, %v4632_v30  ;;  %2830 = vmatpush1.bf16.msra.mxu1 %v2829_v34  ;;  %v4629_v5 = vand.u32 4294901760, %v3485_v55  ;;  %v4630_v61 = vand.u32 4294901760, %v3487_v3 }
  0x8b   :  { %v304_v1 = vand.u32 4294901760, %v303_v7  ;;  %v2639_v17 = vpack.c.bf16 %v482_v43, %v470_v48  ;;  %v2831_v9 = vpack.c.bf16 %v1680_v19, %v1668_v27  ;;  %v3820_v44 = vand.u32 4294901760, %v50_v31  ;;  %v4771_v43 = vld [vmem:[#allocation75_spill] sm:$0xff] }
  0x8c   :  { %v476_v24 = vand.u32 4294901760, %v475_v26  ;;  %v488_v57 = vand.u32 4294901760, %v487_v20  ;;  %v1673_v59 = vsub.f32 %v3485_v55, %v4629_v5  ;;  %v1685_v7 = vsub.f32 %v3487_v3, %v4630_v61 }
  0x8d   :  { %4770 = vst [vmem:[#allocation65_spill] sm:$0xff] %v3820_v44  ;;  %305 = vmatmul.mubr.f32.gmra.mrb[12].mxu0 %v304_v1  ;;  %2640 = vmatprep.subr.bf16.mxu0 %v2639_v17  ;;  %v4631_v48 = vand.u32 4294901760, %v3493_v33  ;;  %v4633_v34 = vand.u32 4294901760, %v4771_v43  ;;  %v3831_v20 = vsub.f32 %v50_v31, %v3820_v44  ;;  %v4635_v17 = vand.u32 4294901760, %v3499_v52 }
  0x8e   :  { %1503 = vmatmul.mubr.f32.gmra.mrb[12].mxu1 %v304_v1  ;;  %2832 = vmatprep.subr.bf16.mxu1 %v2831_v9  ;;  %v2641_v19 = vpack.c.bf16 %v488_v57, %v476_v24  ;;  %v4638_v26 = vand.u32 4294901760, %v3506_v56  ;;  %v1674_v27 = vand.u32 4294901760, %v1673_v59  ;;  %v1686_v5 = vand.u32 4294901760, %v1685_v7 }
  0x8f   :  { %4772 = vst [vmem:[#allocation67_spill] sm:$0xff] %v3831_v20  ;;  %310 = vmatprep.mubr.f32.mxu0 %v4737_v13  ;;  %1508 = vmatprep.mubr.f32.mxu1 %v4737_v13  ;;  %v493_v61 = vsub.f32 %v3493_v33, %v4631_v48  ;;  %v505_v1 = vsub.f32 %v4771_v43, %v4633_v34  ;;  %v3844_v31 = vand.u32 4294901760, %v3831_v20  ;;  %v4646_v24 = vand.u32 4294901760, %v3510_v0 }
  0x90   :  { %2642 = vmatpush1.bf16.msra.mxu0 %v2641_v19  ;;  %v1691_v57 = vsub.f32 %v3499_v52, %v4635_v17  ;;  %v1703_v9 = vsub.f32 %v3506_v56, %v4638_v26  ;;  %v2833_v59 = vpack.c.bf16 %v1686_v5, %v1674_v27  ;;  %v4645_v30 = vand.u32 4294901760, %v3512_v23 }
  0x91   :  { %4773 = vst [vmem:[#allocation75_spill] sm:$0xff] %v3844_v31  ;;  %v494_v7 = vand.u32 4294901760, %v493_v61  ;;  %v506_v48 = vand.u32 4294901760, %v505_v1  ;;  %v314_v19 = vsub.f32 %v3831_v20, %v3844_v31  ;;  %v499_v17 = vsub.f32 %v3510_v0, %v4646_v24  ;;  %v4774_v31 = vld [vmem:[#allocation12_spill] sm:$0xff] }
  0x92   :  { %v1692_v34 = vand.u32 4294901760, %v1691_v57  ;;  %v1704_v10 = vand.u32 4294901760, %v1703_v9  ;;  %2834 = vmatpush1.bf16.msra.mxu1 %v2833_v59  ;;  %v511_v26 = vsub.f32 %v3512_v23, %v4645_v30  ;;  %v4647_v5 = vand.u32 4294901760, %v3516_v25  ;;  %v4775_v57 = vld [vmem:[#allocation13_spill] sm:$0xff]  ;;  %v4777_v30 = vld [vmem:[#allocation16_spill] sm:$0xff] }
  0x93   :  { %v2643_v18 = vpack.c.bf16 %v506_v48, %v494_v7  ;;  %v4648_v61 = vand.u32 4294901760, %v3518_v4  ;;  %v315_v27 = vand.u32 4294901760, %v314_v19  ;;  %v500_v44 = vand.u32 4294901760, %v499_v17  ;;  %v4776_v7 = vld [vmem:[#allocation14_spill] sm:$0xff]  ;;  %v4780_v19 = vld [vmem:[#allocation21_spill] sm:$0xff] }
  0x94   :  { %v2835_v1 = vpack.c.bf16 %v1704_v10, %v1692_v34  ;;  %v2647_v9 = vpack.c.bf16 %v4775_v57, %v4774_v31  ;;  %v512_v20 = vand.u32 4294901760, %v511_v26  ;;  %v1697_v48 = vsub.f32 %v3516_v25, %v4647_v5  ;;  %v4778_v10 = vld [vmem:[#allocation18_spill] sm:$0xff]  ;;  %v4779_v34 = vld [vmem:[#allocation19_spill] sm:$0xff] }
  0x95   :  { %2644 = vmatprep.subr.bf16.mxu0 %v2643_v18  ;;  %v1709_v59 = vsub.f32 %v3518_v4, %v4648_v61  ;;  %v2839_v24 = vpack.c.bf16 %v4777_v30, %v4776_v7  ;;  %316 = vmatmul.mubr.f32.gmra.mrb[14].mxu0 %v315_v27  ;;  %v2649_v17 = vpack.c.bf16 %v4779_v34, %v4778_v10  ;;  %v4792_v10 = vand.u32 4294901760, %v3359_v14 }
  0x96   :  { %1514 = vmatmul.mubr.f32.gmra.mrb[14].mxu1 %v315_v27  ;;  %v2841_v18 = vpack.c.bf16 %v3321_v41, %v4780_v19  ;;  %v2651_v26 = vpack.c.bf16 %v3327_v47, %v3323_v42  ;;  %2836 = vmatprep.subr.bf16.mxu1 %v2835_v1  ;;  %v2645_v5 = vpack.c.bf16 %v512_v20, %v500_v44  ;;  %v1698_v57 = vand.u32 4294901760, %v1697_v48  ;;  %v4781_v44 = vld [vmem:[#allocation76_spill] sm:$0xff]  ;;  %v4782_v48 = vld [vmem:[#allocation41_spill] sm:$0xff] }
  0x97   :  { %v1710_v31 = vand.u32 4294901760, %v1709_v59  ;;  %546 = vmatprep.mubr.f32.mxu0 %v4737_v13  ;;  %v2843_v61 = vpack.c.bf16 %v3334_v51, %v3331_v49  ;;  %1744 = vmatprep.mubr.f32.mxu1 %v4737_v13  ;;  %v2653_v27 = vpack.c.bf16 %v3342_v62, %v3336_v53  ;;  %v2845_v41 = vpack.c.bf16 %v3348_v6, %v3344_v63 }
  0x98   :  { %2646 = vmatpush1.bf16.msra.mxu0 %v2645_v5  ;;  %v2655_v20 = vpack.c.bf16 %v3355_v12, %v3352_v8  ;;  %v2847_v1 = vpack.c.bf16 %v3361_v15, %v3359_v14  ;;  %v2659_v5 = vpack.c.bf16 %v3384_v58, %v3380_v54  ;;  %v2853_v59 = vpack.c.bf16 %v4782_v48, %v3402_v32 }
  0x99   :  { %v2837_v19 = vpack.c.bf16 %v1710_v31, %v1698_v57  ;;  %2648 = vmatprep.subr.bf16.mxu0 %v2647_v9  ;;  %v2657_v31 = vpack.c.bf16 %v3370_v36, %v3368_v35  ;;  %v2851_v57 = vpack.c.bf16 %v3391_v2, %v3388_v60  ;;  %v2661_v9 = vpack.c.bf16 %v3398_v37, %v3394_v22 }
  0x9a   :  { %v4788_v51 = vand.u32 4294901760, %v3344_v63  ;;  %v4789_v49 = vand.u32 4294901760, %v3348_v6  ;;  %v4791_v42 = vand.u32 4294901760, %v3355_v12  ;;  %v4793_v30 = vand.u32 4294901760, %v3361_v15 }
  0x9b   :  { %2838 = vmatpush1.bf16.msra.mxu1 %v2837_v19  ;;  %548 = vmatmul.mubr.f32.vlgmr.msra.gmra.mrb[0].mxu0 %v4781_v44  ;;  %v4784_v19 = vld [vmem:[#allocation44_spill] sm:$0xff]  ;;  %v4794_v63 = vand.u32 4294901760, %v3368_v35  ;;  %v4796_v6 = vand.u32 4294901760, %v3374_v45  ;;  %v4798_v12 = vand.u32 4294901760, %v3380_v54  ;;  %v4799_v14 = vand.u32 4294901760, %v3384_v58 }
  0x9c   :  { %2840 = vmatprep.subr.bf16.mxu1 %v2839_v24  ;;  %2650 = vmatpush1.bf16.msra.mxu0 %v2649_v17  ;;  %v2849_v24 = vpack.c.bf16 %v3376_v50, %v3374_v45  ;;  %v4783_v17 = vld [vmem:[#allocation43_spill] sm:$0xff]  ;;  %v3921_v47 = vpack.c.bf16 %v4789_v49, %v4788_v51  ;;  %v3933_v7 = vpack.c.bf16 %v4793_v30, %v4792_v10  ;;  %v4795_v49 = vand.u32 4294901760, %v3370_v36 }
  0x9d   :  { %553 = vmatprep.mubr.f32.mxu0 %v4737_v13  ;;  %2652 = vmatprep.subr.bf16.mxu0 %v2651_v26  ;;  %v4785_v26 = vld [vmem:[#allocation45_spill] sm:$0xff]  ;;  %v3952_v15 = vpack.c.bf16 %v4799_v14, %v4798_v12  ;;  %v4801_v35 = vand.u32 4294901760, %v3388_v60  ;;  %v4802_v36 = vand.u32 4294901760, %v3391_v2  ;;  %v4803_v45 = vand.u32 4294901760, %v3394_v22 }
  0x9e   :  { %1746 = vmatmul.mubr.f32.vlgmr.msra.gmra.mrb[0].mxu1 %v4781_v44  ;;  %v4786_v44 = vld [vmem:[#allocation47_spill] sm:$0xff]  ;;  %v3940_v51 = vpack.c.bf16 %v4795_v49, %v4794_v63  ;;  %v4805_v54 = vand.u32 4294901760, %v3402_v32  ;;  %v4806_v58 = vand.u32 4294901760, %v4782_v48  ;;  %v4807_v60 = vand.u32 4294901760, %v4783_v17 }
  0x9f   :  { %2842 = vmatpush1.bf16.msra.mxu1 %v2841_v18  ;;  %1751 = vmatprep.mubr.f32.mxu1 %v4737_v13  ;;  %v2663_v18 = vpack.c.bf16 %v4784_v19, %v4783_v17  ;;  %v2855_v62 = vpack.c.bf16 %v4786_v44, %v4785_v26  ;;  %v3959_v30 = vpack.c.bf16 %v4802_v36, %v4801_v35  ;;  %v4808_v2 = vand.u32 4294901760, %v4784_v19  ;;  %v4815_v19 = vld [vmem:[#allocation53_spill] sm:$0xff] }
  0xa0   :  { %555 = vmatmul.mubr.f32.gmra.mrb[2].mxu0 %v3562_v28  ;;  %2844 = vmatprep.subr.bf16.mxu1 %v2843_v61  ;;  %v4787_v61 = vld [vmem:[#allocation50_spill] sm:$0xff]  ;;  %v4809_v22 = vand.u32 4294901760, %v4785_v26  ;;  %v4811_v32 = vand.u32 4294901760, %v4750_v16  ;;  %v4816_v49 = vand.u32 4294901760, %v4815_v19  ;;  %v4817_v26 = vld [vmem:[#allocation55_spill] sm:$0xff] }
  0xa1   :  { %2654 = vmatpush1.bf16.msra.mxu0 %v2653_v27  ;;  %560 = vmatprep.mubr.f32.mxu0 %v4737_v13  ;;  %v2665_v53 = vpack.c.bf16 %v4787_v61, %v4750_v16  ;;  %v4790_v27 = vand.u32 4294901760, %v3352_v8  ;;  %v4812_v48 = vand.u32 4294901760, %v4787_v61  ;;  %v4821_v16 = vld [vmem:[#allocation57_spill] sm:$0xff]  ;;  %v4823_v61 = vld [vmem:[#allocation59_spill] sm:$0xff] }
  0xa2   :  { %1753 = vmatmul.mubr.f32.gmra.mrb[2].mxu1 %v3562_v28  ;;  %2656 = vmatprep.subr.bf16.mxu0 %v2655_v20  ;;  %v3971_v20 = vpack.c.bf16 %v4806_v58, %v4805_v54  ;;  %v4822_v35 = vand.u32 4294901760, %v4821_v16  ;;  %v4824_v36 = vand.u32 4294901760, %v4823_v61  ;;  %v4827_v58 = vand.u32 4294901760, %v4762_v11 }
  0xa3   :  { %v3927_v34 = vpack.c.bf16 %v4791_v42, %v4790_v27  ;;  %2846 = vmatpush1.bf16.msra.mxu1 %v2845_v41  ;;  %1758 = vmatprep.mubr.f32.mxu1 %v4737_v13  ;;  %v4797_v42 = vand.u32 4294901760, %v3376_v50  ;;  %v4800_v41 = vld [vmem:[#allocation85_spill] sm:$0xff]  ;;  %v4804_v50 = vand.u32 4294901760, %v3398_v37  ;;  %v4810_v37 = vand.u32 4294901760, %v4786_v44  ;;  %v4819_v44 = vld [vmem:[#allocation56_spill] sm:$0xff] }
  0xa4   :  { %562 = vmatmul.mubr.f32.gmra.mrb[4].mxu0 %v4800_v41  ;;  %2848 = vmatprep.subr.bf16.mxu1 %v2847_v1  ;;  %v3978_v1 = vpack.c.bf16 %v4808_v2, %v4807_v60  ;;  %v3990_v63 = vpack.c.bf16 %v4812_v48, %v4811_v32  ;;  %v4820_v12 = vand.u32 4294901760, %v4819_v44  ;;  %v4828_v60 = vand.u32 4294901760, %v4763_v39 }
  0xa5   :  { %v3946_v8 = vpack.c.bf16 %v4797_v42, %v4796_v6  ;;  %v3965_v10 = vpack.c.bf16 %v4804_v50, %v4803_v45  ;;  %2658 = vmatpush1.bf16.msra.mxu0 %v2657_v31  ;;  %567 = vmatprep.mubr.f32.mxu0 %v4737_v13  ;;  %v3984_v27 = vpack.c.bf16 %v4810_v37, %v4809_v22  ;;  %v4813_v31 = vld [vmem:[#allocation52_spill] sm:$0xff]  ;;  %v4818_v42 = vand.u32 4294901760, %v4817_v26 }
  0xa6   :  { %1760 = vmatmul.mubr.f32.gmra.mrb[4].mxu1 %v4800_v41  ;;  %2660 = vmatprep.subr.bf16.mxu0 %v2659_v5  ;;  %v4814_v17 = vand.u32 4294901760, %v4813_v31  ;;  %v4009_v45 = vpack.c.bf16 %v4824_v36, %v4822_v35  ;;  %v4825_v5 = vand.u32 4294901760, %v4760_v40  ;;  %v4826_v50 = vand.u32 4294901760, %v4761_v21  ;;  %v4830_v37 = vld [vmem:[#allocation68_spill] sm:$0xff] }
  0xa7   :  { %v4003_v14 = vpack.c.bf16 %v4820_v12, %v4818_v42  ;;  %2850 = vmatpush1.bf16.msra.mxu1 %v2849_v24  ;;  %1765 = vmatprep.mubr.f32.mxu1 %v4737_v13  ;;  %v4022_v2 = vpack.c.bf16 %v4828_v60, %v4827_v58  ;;  %v4829_v22 = vand.u32 4294901760, %v4766_v38  ;;  %v4831_v32 = vand.u32 4294901760, %v4830_v37  ;;  %v4832_v24 = vld [vmem:[#allocation88_spill] sm:$0xff]  ;;  %v4835_v42 = vld [vmem:[#allocation71_spill] sm:$0xff] }
  0xa8   :  { %v3997_v6 = vpack.c.bf16 %v4816_v49, %v4814_v17  ;;  %v4016_v54 = vpack.c.bf16 %v4826_v50, %v4825_v5  ;;  %569 = vmatmul.mubr.f32.gmra.mrb[6].mxu0 %v4832_v24  ;;  %2852 = vmatprep.subr.bf16.mxu1 %v2851_v57  ;;  %v4833_v17 = vld [vmem:[#allocation69_spill] sm:$0xff]  ;;  %v4836_v12 = vand.u32 4294901760, %v4835_v42  ;;  %v4837_v36 = vand.u32 4294901760, %v3479_v29 }
  0xa9   :  { %v4028_v48 = vpack.c.bf16 %v4831_v32, %v4829_v22  ;;  %v4834_v49 = vand.u32 4294901760, %v4833_v17  ;;  %v4838_v5 = vand.u32 4294901760, %v3481_v46  ;;  %v4839_v58 = vand.u32 4294901760, %v3485_v55  ;;  %2662 = vmatpush1.bf16.msra.mxu0 %v2661_v9  ;;  %574 = vmatprep.mubr.f32.mxu0 %v4737_v13 }
  0xaa   :  { %v4840_v60 = vand.u32 4294901760, %v3487_v3  ;;  %v4841_v57 = vand.u32 4294901760, %v3493_v33  ;;  %v4842_v32 = vand.u32 4294901760, %v4771_v43  ;;  %v4845_v41 = vand.u32 4294901760, %v3510_v0  ;;  %1767 = vmatmul.mubr.f32.gmra.mrb[6].mxu1 %v4832_v24  ;;  %2664 = vmatprep.subr.bf16.mxu0 %v2663_v18 }
  0xab   :  { %v4035_v35 = vpack.c.bf16 %v4836_v12, %v4834_v49  ;;  %v4041_v50 = vpack.c.bf16 %v4838_v5, %v4837_v36  ;;  %v4843_v12 = vand.u32 4294901760, %v3499_v52  ;;  %v4844_v36 = vand.u32 4294901760, %v3506_v56  ;;  %2854 = vmatpush1.bf16.msra.mxu1 %v2853_v59  ;;  %1772 = vmatprep.mubr.f32.mxu1 %v4737_v13 }
  0xac   :  { %v4047_v22 = vpack.c.bf16 %v4840_v60, %v4839_v58  ;;  %v4054_v49 = vpack.c.bf16 %v4842_v32, %v4841_v57  ;;  %v4846_v58 = vand.u32 4294901760, %v3512_v23  ;;  %v2667_v9 = vpack.c.bf16 %v4819_v44, %v4817_v26  ;;  %2856 = vmatprep.subr.bf16.mxu1 %v2855_v62  ;;  %v4863_v44 = vld [vmem:[#allocation32_spill] sm:$0xff] }
  0xad   :  { %v4060_v5 = vpack.c.bf16 %v4844_v36, %v4843_v12  ;;  %v4847_v57 = vand.u32 4294901760, %v3516_v25  ;;  %v4848_v32 = vand.u32 4294901760, %v3518_v4  ;;  %v2857_v12 = vpack.c.bf16 %v4815_v19, %v4813_v31  ;;  %2666 = vmatpush1.bf16.msra.mxu0 %v2665_v53  ;;  %v4850_v31 = vld [vmem:[#allocation49_spill] sm:$0xff] }
  0xae   :  { %v4066_v60 = vpack.c.bf16 %v4846_v58, %v4845_v41  ;;  %v4849_v41 = vld [vmem:[#allocation91_spill] sm:$0xff]  ;;  %v2859_v18 = vpack.c.bf16 %v4823_v61, %v4821_v16  ;;  %v2669_v26 = vpack.c.bf16 %v4761_v21, %v4760_v40  ;;  %2668 = vmatprep.subr.bf16.mxu0 %v2667_v9  ;;  %v2671_v59 = vpack.c.bf16 %v4830_v37, %v4766_v38  ;;  %v4862_v19 = vld [vmem:[#allocation33_spill] sm:$0xff]  ;;  %v4864_v16 = vld [vmem:[#allocation86_spill] sm:$0xff] }
  0xaf   :  { %v4075_v28 = vpack.c.bf16 %v4848_v32, %v4847_v57  ;;  %576 = vmatmul.mubr.f32.gmra.mrb[8].mxu0 %v4849_v41  ;;  %1774 = vmatmul.mubr.f32.gmra.mrb[8].mxu1 %v4849_v41  ;;  %v2861_v62 = vpack.c.bf16 %v4763_v39, %v4762_v11  ;;  %v2863_v53 = vpack.c.bf16 %v4835_v42, %v4833_v17  ;;  %v4851_v11 = vld [vmem:[#allocation61_spill] sm:$0xff]  ;;  %v4865_v61 = vld [vmem:[#allocation34_spill] sm:$0xff]  ;;  %v4866_v37 = vld [vmem:[#allocation35_spill] sm:$0xff] }
  0xb0   :  { %581 = vmatprep.mubr.f32.mxu0 %v4737_v13  ;;  %2858 = vmatpush1.bf16.msra.mxu1 %v2857_v12  ;;  %v2673_v21 = vpack.c.bf16 %v3481_v46, %v3479_v29  ;;  %v2675_v40 = vpack.c.bf16 %v4771_v43, %v3493_v33  ;;  %v2865_v39 = vpack.c.bf16 %v3487_v3, %v3485_v55  ;;  %v4852_v3 = vld [vmem:[#allocation65_spill] sm:$0xff]  ;;  %v4853_v29 = vld [vmem:[#allocation11_spill] sm:$0xff]  ;;  %v4861_v43 = vld [vmem:[#allocation30_spill] sm:$0xff] }
  0xb1   :  { %1779 = vmatprep.mubr.f32.mxu1 %v4737_v13  ;;  %2860 = vmatprep.subr.bf16.mxu1 %v2859_v18  ;;  %v2867_v38 = vpack.c.bf16 %v3506_v56, %v3499_v52  ;;  %v2677_v46 = vpack.c.bf16 %v3512_v23, %v3510_v0  ;;  %v2869_v55 = vpack.c.bf16 %v3518_v4, %v3516_v25  ;;  %v4854_v23 = vld [vmem:[#allocation80_spill] sm:$0xff]  ;;  %v4855_v33 = vld [vmem:[#allocation15_spill] sm:$0xff]  ;;  %v4856_v52 = vld [vmem:[#allocation17_spill] sm:$0xff] }
  0xb2   :  { %2670 = vmatpush1.bf16.msra.mxu0 %v2669_v26  ;;  %v4857_v25 = vld [vmem:[#allocation24_spill] sm:$0xff]  ;;  %v4859_v0 = vld [vmem:[#allocation83_spill] sm:$0xff]  ;;  %v4860_v4 = vld [vmem:[#allocation26_spill] sm:$0xff] }
  0xb3   :  { %583 = vmatmul.mubr.f32.gmra.mrb[10].mxu0 %v4850_v31  ;;  %1781 = vmatmul.mubr.f32.gmra.mrb[10].mxu1 %v4850_v31  ;;  %v4858_v56 = vld [vmem:[#allocation20_spill] sm:$0xff]  ;;  %v4867_v17 = vld [vmem:[#allocation37_spill] sm:$0xff]  ;;  %v4870_v58 = vld [vmem:[#allocation38_spill] sm:$0xff] }
  0xb4   :  { %588 = vmatprep.mubr.f32.mxu0 %v4737_v13  ;;  %2672 = vmatprep.subr.bf16.mxu0 %v2671_v59  ;;  %v4868_v42 = vld [vmem:[#allocation36_spill] sm:$0xff]  ;;  %v4869_v36 = vld [vmem:[#allocation89_spill] sm:$0xff]  ;;  %v4871_v9 = vld [vmem:[#allocation39_spill] sm:$0xff] }
  0xb5   :  { %2862 = vmatpush1.bf16.msra.mxu1 %v2861_v62  ;;  %1786 = vmatprep.mubr.f32.mxu1 %v4737_v13  ;;  %v4872_v57 = vld [vmem:[#allocation42_spill] sm:$0xff]  ;;  %v4873_v32 = vld [vmem:[#allocation40_spill] sm:$0xff]  ;;  %v4878_v62 = vld [vmem:[#allocation51_spill] sm:$0xff] }
  0xb6   :  { %2864 = vmatprep.subr.bf16.mxu1 %v2863_v53  ;;  %2674 = vmatpush1.bf16.msra.mxu0 %v2673_v21  ;;  %v4874_v12 = vld [vmem:[#allocation92_spill] sm:$0xff]  ;;  %v4875_v18 = vld [vmem:[#allocation46_spill] sm:$0xff] }
  0xb7   :  { %590 = vmatmul.mubr.f32.gmra.mrb[12].mxu0 %v4851_v11  ;;  %1788 = vmatmul.mubr.f32.gmra.mrb[12].mxu1 %v4851_v11  ;;  %v4876_v26 = vld [vmem:[#allocation48_spill] sm:$0xff]  ;;  %v4877_v59 = vld [vmem:[#allocation54_spill] sm:$0xff]  ;;  %v4892_v11 = vld [vmem:[#allocation73_spill] sm:$0xff] }
  0xb8   :  { %595 = vmatprep.mubr.f32.mxu0 %v4737_v13  ;;  %2676 = vmatprep.subr.bf16.mxu0 %v2675_v40  ;;  %v4879_v53 = vld [vmem:[#allocation94_spill] sm:$0xff]  ;;  %v4881_v40 = vld [vmem:[#allocation60_spill] sm:$0xff] }
  0xb9   :  { %2866 = vmatpush1.bf16.msra.mxu1 %v2865_v39  ;;  %1793 = vmatprep.mubr.f32.mxu1 %v4737_v13  ;;  %v4880_v21 = vld [vmem:[#allocation58_spill] sm:$0xff] }
  0xba   :  { %2868 = vmatprep.subr.bf16.mxu1 %v2867_v38  ;;  %2678 = vmatpush1.bf16.msra.mxu0 %v2677_v46  ;;  %v4882_v39 = vld [vmem:[#allocation66_spill] sm:$0xff]  ;;  %v4883_v38 = vld [vmem:[#allocation63_spill] sm:$0xff] }
  0xbb   :  { %597 = vmatmul.mubr.f32.gmra.mrb[14].mxu0 %v4852_v3  ;;  %1795 = vmatmul.mubr.f32.gmra.mrb[14].mxu1 %v4852_v3  ;;  %v4884_v46 = vld [vmem:[#allocation62_spill] sm:$0xff] }
  0xbc   :  { %731 = vmatprep.mubr.f32.mxu0 %v4737_v13  ;;  %2680 = vmatprep.subr.bf16.mxu0 %v4853_v29  ;;  %v4899_v31 = vld [vmem:[#allocation78_spill] sm:$0xff] }
  0xbd   :  { %2870 = vmatpush1.bf16.msra.mxu1 %v2869_v55  ;;  %1929 = vmatprep.mubr.f32.mxu1 %v4737_v13  ;;  %v4885_v55 = vld [vmem:[#allocation70_spill] sm:$0xff] }
  0xbe   :  { %2872 = vmatprep.subr.bf16.mxu1 %v4855_v33 }
  0xbf   :  { %734 = vmatmul.mubr.f32.vlgmr.msra.gmra.mrb[0].mxu0 %v4854_v23 }
  0xc0   :  { %2682 = vmatpush1.bf16.msra.mxu0 %v4856_v52  ;;  %739 = vmatprep.mubr.f32.mxu0 %v4737_v13 }
  0xc1   :  { %1932 = vmatmul.mubr.f32.vlgmr.msra.gmra.mrb[0].mxu1 %v4854_v23  ;;  %2684 = vmatprep.subr.bf16.mxu0 %v4857_v25  ;;  %v4886_v23 = vld [vmem:[#allocation72_spill] sm:$0xff] }
  0xc2   :  { %2874 = vmatpush1.bf16.msra.mxu1 %v4858_v56  ;;  %1937 = vmatprep.mubr.f32.mxu1 %v4737_v13 }
  0xc3   :  { %742 = vmatmul.mubr.f32.gmra.mrb[2].mxu0 %v4859_v0  ;;  %2876 = vmatprep.subr.bf16.mxu1 %v4860_v4 }
  0xc4   :  { %2686 = vmatpush1.bf16.msra.mxu0 %v4861_v43  ;;  %747 = vmatprep.mubr.f32.mxu0 %v4737_v13 }
  0xc5   :  { %1940 = vmatmul.mubr.f32.gmra.mrb[2].mxu1 %v4859_v0  ;;  %2688 = vmatprep.subr.bf16.mxu0 %v4862_v19  ;;  %v4887_v0 = vld [vmem:[#allocation74_spill] sm:$0xff] }
  0xc6   :  { %2878 = vmatpush1.bf16.msra.mxu1 %v4863_v44  ;;  %1945 = vmatprep.mubr.f32.mxu1 %v4737_v13 }
  0xc7   :  { %750 = vmatmul.mubr.f32.gmra.mrb[4].mxu0 %v4864_v16  ;;  %2880 = vmatprep.subr.bf16.mxu1 %v4865_v61 }
  0xc8   :  { %2690 = vmatpush1.bf16.msra.mxu0 %v4866_v37  ;;  %755 = vmatprep.mubr.f32.mxu0 %v4737_v13 }
  0xc9   :  { %1948 = vmatmul.mubr.f32.gmra.mrb[4].mxu1 %v4864_v16  ;;  %2692 = vmatprep.subr.bf16.mxu0 %v4867_v17  ;;  %v4888_v16 = vld [vmem:[#allocation12_spill] sm:$0xff] }
  0xca   :  { %2882 = vmatpush1.bf16.msra.mxu1 %v4868_v42  ;;  %1953 = vmatprep.mubr.f32.mxu1 %v4737_v13 }
  0xcb   :  { %758 = vmatmul.mubr.f32.gmra.mrb[6].mxu0 %v4869_v36  ;;  %2884 = vmatprep.subr.bf16.mxu1 %v4870_v58 }
  0xcc   :  { %2694 = vmatpush1.bf16.msra.mxu0 %v4871_v9  ;;  %763 = vmatprep.mubr.f32.mxu0 %v4737_v13 }
  0xcd   :  { %1956 = vmatmul.mubr.f32.gmra.mrb[6].mxu1 %v4869_v36  ;;  %2696 = vmatprep.subr.bf16.mxu0 %v4872_v57  ;;  %v4889_v36 = vand.u32 4294901760, %v4888_v16  ;;  %v4900_v16 = vld [vmem:[#allocation18_spill] sm:$0xff] }
  0xce   :  { %2886 = vmatpush1.bf16.msra.mxu1 %v4873_v32  ;;  %1961 = vmatprep.mubr.f32.mxu1 %v4737_v13 }
  0xcf   :  { %766 = vmatmul.mubr.f32.gmra.mrb[8].mxu0 %v4874_v12  ;;  %2888 = vmatprep.subr.bf16.mxu1 %v4875_v18  ;;  %v4913_v18 = vld [vmem:[#allocation81_spill] sm:$0xff] }
  0xd0   :  { %2698 = vmatpush1.bf16.msra.mxu0 %v4876_v26  ;;  %771 = vmatprep.mubr.f32.mxu0 %v4737_v13  ;;  %v4908_v26 = vld [vmem:[#allocation79_spill] sm:$0xff] }
  0xd1   :  { %1964 = vmatmul.mubr.f32.gmra.mrb[8].mxu1 %v4874_v12  ;;  %2700 = vmatprep.subr.bf16.mxu0 %v4877_v59  ;;  %v4890_v12 = vld [vmem:[#allocation13_spill] sm:$0xff] }
  0xd2   :  { %2890 = vmatpush1.bf16.msra.mxu1 %v4878_v62  ;;  %1969 = vmatprep.mubr.f32.mxu1 %v4737_v13 }
  0xd3   :  { %774 = vmatmul.mubr.f32.gmra.mrb[10].mxu0 %v4879_v53  ;;  %2892 = vmatprep.subr.bf16.mxu1 %v4880_v21 }
  0xd4   :  { %2702 = vmatpush1.bf16.msra.mxu0 %v4881_v40  ;;  %779 = vmatprep.mubr.f32.mxu0 %v4737_v13  ;;  %v4897_v40 = vld [vmem:[#allocation16_spill] sm:$0xff] }
  0xd5   :  { %1972 = vmatmul.mubr.f32.gmra.mrb[10].mxu1 %v4879_v53  ;;  %2704 = vmatprep.subr.bf16.mxu0 %v4882_v39  ;;  %v4891_v53 = vand.u32 4294901760, %v4890_v12  ;;  %v4898_v21 = vand.u32 4294901760, %v4897_v40  ;;  %v4901_v12 = vand.u32 4294901760, %v4900_v16 }
  0xd6   :  { %2894 = vmatpush1.bf16.msra.mxu1 %v4883_v38  ;;  %1977 = vmatprep.mubr.f32.mxu1 %v4737_v13  ;;  %v4893_v38 = vld [vmem:[#allocation67_spill] sm:$0xff] }
  0xd7   :  { %782 = vmatmul.mubr.f32.gmra.mrb[12].mxu0 %v4884_v46  ;;  %2896 = vmatprep.subr.bf16.mxu1 %v4885_v55  ;;  %v2711_v3 = vpack.c.bf16 %v4891_v53, %v4889_v36  ;;  %v4894_v55 = vld [vmem:[#allocation77_spill] sm:$0xff]  ;;  %v4902_v36 = vld [vmem:[#allocation19_spill] sm:$0xff] }
  0xd8   :  { %2706 = vmatpush1.bf16.msra.mxu0 %v4886_v23  ;;  %787 = vmatprep.mubr.f32.mxu0 %v4737_v13  ;;  %v4895_v23 = vld [vmem:[#allocation14_spill] sm:$0xff]  ;;  %v4903_v53 = vand.u32 4294901760, %v4902_v36 }
  0xd9   :  { %1980 = vmatmul.mubr.f32.gmra.mrb[12].mxu1 %v4884_v46  ;;  %2708 = vmatprep.subr.bf16.mxu0 %v4887_v0  ;;  %v4896_v39 = vand.u32 4294901760, %v4895_v23  ;;  %v4904_v0 = vld [vmem:[#allocation23_spill] sm:$0xff] }
  0xda   :  { %2898 = vmatpush1.bf16.msra.mxu1 %v4892_v11  ;;  %1985 = vmatprep.mubr.f32.mxu1 %v4737_v13  ;;  %v2713_v11 = vpack.c.bf16 %v4903_v53, %v4901_v12  ;;  %v4905_v62 = vand.u32 4294901760, %v4904_v0  ;;  %v4914_v12 = vld [vmem:[#allocation27_spill] sm:$0xff] }
  0xdb   :  { %790 = vmatmul.mubr.f32.gmra.mrb[14].mxu0 %v4893_v38  ;;  %2900 = vmatprep.subr.bf16.mxu1 %v4894_v55  ;;  %v2903_v46 = vpack.c.bf16 %v4898_v21, %v4896_v39  ;;  %v4906_v55 = vld [vmem:[#allocation25_spill] sm:$0xff]  ;;  %v4911_v39 = vld [vmem:[#allocation22_spill] sm:$0xff] }
  0xdc   :  { %2710 = vmatpush1.bf16.msra.mxu0 %v4899_v31  ;;  %892 = vmatprep.mubr.f32.mxu0 %v4737_v13  ;;  %v4907_v59 = vand.u32 4294901760, %v4906_v55  ;;  %v4909_v21 = vld [vmem:[#allocation21_spill] sm:$0xff]  ;;  %v4912_v31 = vand.u32 4294901760, %v4911_v39  ;;  %v4920_v55 = vld [vmem:[#allocation31_spill] sm:$0xff] }
  0xdd   :  { %1988 = vmatmul.mubr.f32.gmra.mrb[14].mxu1 %v4893_v38  ;;  %2712 = vmatprep.subr.bf16.mxu0 %v2711_v3  ;;  %v4910_v40 = vand.u32 4294901760, %v4909_v21  ;;  %v4915_v38 = vand.u32 4294901760, %v4914_v12  ;;  %v4916_v3 = vld [vmem:[#allocation28_spill] sm:$0xff]  ;;  %v4921_v53 = vand.u32 4294901760, %v4920_v55 }
  0xde   :  { %v2715_v23 = vpack.c.bf16 %v4907_v59, %v4905_v62  ;;  %2902 = vmatpush1.bf16.msra.mxu1 %v4908_v26  ;;  %2090 = vmatprep.mubr.f32.mxu1 %v4737_v13  ;;  %v4917_v36 = vand.u32 4294901760, %v4916_v3  ;;  %v4918_v59 = vld [vmem:[#allocation29_spill] sm:$0xff] }
  0xdf   :  { %v2905_v16 = vpack.c.bf16 %v4912_v31, %v4910_v40  ;;  %896 = vmatmul.mubr.f32.vlgmr.msra.gmra.mrb[0].mxu0 %v4913_v18  ;;  %2904 = vmatprep.subr.bf16.mxu1 %v2903_v46  ;;  %v4919_v62 = vand.u32 4294901760, %v4918_v59  ;;  %v4922_v31 = vld [vmem:[#allocation84_spill] sm:$0xff] }
  0xe0   :  { %v2907_v0 = vpack.c.bf16 %v4917_v36, %v4915_v38  ;;  %2714 = vmatpush1.bf16.msra.mxu0 %v2713_v11  ;;  %901 = vmatprep.mubr.f32.mxu0 %v4737_v13  ;;  %v4923_v11 = vld [vmem:[#allocation87_spill] sm:$0xff] }
  0xe1   :  { %v2717_v26 = vpack.c.bf16 %v4921_v53, %v4919_v62  ;;  %2094 = vmatmul.mubr.f32.vlgmr.msra.gmra.mrb[0].mxu1 %v4913_v18  ;;  %2716 = vmatprep.subr.bf16.mxu0 %v2715_v23 }
  0xe2   :  { %2906 = vmatpush1.bf16.msra.mxu1 %v2905_v16  ;;  %2099 = vmatprep.mubr.f32.mxu1 %v4737_v13 }
  0xe3   :  { %905 = vmatmul.mubr.f32.gmra.mrb[2].mxu0 %v4922_v31  ;;  %2908 = vmatprep.subr.bf16.mxu1 %v2907_v0 }
  0xe4   :  { %2718 = vmatpush1.bf16.msra.mxu0 %v2717_v26  ;;  %910 = vmatprep.mubr.f32.mxu0 %v4737_v13 }
  0xe5   :  { %2103 = vmatmul.mubr.f32.gmra.mrb[2].mxu1 %v4922_v31  ;;  %2720 = vmatprep.subr.bf16.mxu0 %v3927_v34  ;;  %v4924_v34 = vld [vmem:[#allocation90_spill] sm:$0xff] }
  0xe6   :  { %2910 = vmatpush1.bf16.msra.mxu1 %v3921_v47  ;;  %2108 = vmatprep.mubr.f32.mxu1 %v4737_v13  ;;  %v4925_v47 = vld [vmem:[#allocation93_spill] sm:$0xff] }
  0xe7   :  { %914 = vmatmul.mubr.f32.gmra.mrb[4].mxu0 %v4923_v11  ;;  %2912 = vmatprep.subr.bf16.mxu1 %v3933_v7  ;;  %v4926_v7 = vld [vmem:[#allocation95_spill] sm:$0xff] }
  0xe8   :  { %2722 = vmatpush1.bf16.msra.mxu0 %v3940_v51  ;;  %919 = vmatprep.mubr.f32.mxu0 %v4737_v13  ;;  %v4927_v51 = vld [vmem:[#allocation64_spill] sm:$0xff] }
  0xe9   :  { %2112 = vmatmul.mubr.f32.gmra.mrb[4].mxu1 %v4923_v11  ;;  %2724 = vmatprep.subr.bf16.mxu0 %v3952_v15  ;;  %v4929_v15 = vld [vmem:[#allocation76_spill] sm:$0xff] }
  0xea   :  { %2914 = vmatpush1.bf16.msra.mxu1 %v3946_v8  ;;  %2117 = vmatprep.mubr.f32.mxu1 %v4737_v13  ;;  %v4928_v8 = vld [vmem:[#allocation75_spill] sm:$0xff] }
  0xeb   :  { %923 = vmatmul.mubr.f32.gmra.mrb[6].mxu0 %v4924_v34  ;;  %2916 = vmatprep.subr.bf16.mxu1 %v3959_v30  ;;  %v4930_v30 = vld [vmem:[#allocation82_spill] sm:$0xff] }
  0xec   :  { %2726 = vmatpush1.bf16.msra.mxu0 %v3965_v10  ;;  %928 = vmatprep.mubr.f32.mxu0 %v4737_v13  ;;  %v4932_v10 = vld [vmem:[#allocation46_spill] sm:$0xff] }
  0xed   :  { %2121 = vmatmul.mubr.f32.gmra.mrb[6].mxu1 %v4924_v34  ;;  %2728 = vmatprep.subr.bf16.mxu0 %v3978_v1  ;;  %v4934_v1 = vld [vmem:[#allocation54_spill] sm:$0xff] }
  0xee   :  { %2918 = vmatpush1.bf16.msra.mxu1 %v3971_v20  ;;  %2126 = vmatprep.mubr.f32.mxu1 %v4737_v13  ;;  %v4933_v20 = vld [vmem:[#allocation48_spill] sm:$0xff] }
  0xef   :  { %932 = vmatmul.mubr.f32.gmra.mrb[8].mxu0 %v4925_v47  ;;  %2920 = vmatprep.subr.bf16.mxu1 %v3984_v27  ;;  %v4935_v27 = vld [vmem:[#allocation51_spill] sm:$0xff] }
  0xf0   :  { %2730 = vmatpush1.bf16.msra.mxu0 %v3990_v63  ;;  %937 = vmatprep.mubr.f32.mxu0 %v4737_v13  ;;  %v4936_v63 = vld [vmem:[#allocation49_spill] sm:$0xff] }
  0xf1   :  { %2130 = vmatmul.mubr.f32.gmra.mrb[8].mxu1 %v4925_v47  ;;  %2732 = vmatprep.subr.bf16.mxu0 %v4003_v14  ;;  %v4938_v14 = vld [vmem:[#allocation60_spill] sm:$0xff] }
  0xf2   :  { %2922 = vmatpush1.bf16.msra.mxu1 %v3997_v6  ;;  %2135 = vmatprep.mubr.f32.mxu1 %v4737_v13  ;;  %v4937_v6 = vld [vmem:[#allocation58_spill] sm:$0xff] }
  0xf3   :  { %941 = vmatmul.mubr.f32.gmra.mrb[10].mxu0 %v4926_v7  ;;  %2924 = vmatprep.subr.bf16.mxu1 %v4009_v45  ;;  %v4939_v45 = vld [vmem:[#allocation66_spill] sm:$0xff] }
  0xf4   :  { %2734 = vmatpush1.bf16.msra.mxu0 %v4016_v54  ;;  %946 = vmatprep.mubr.f32.mxu0 %v4737_v13  ;;  %v4940_v54 = vld [vmem:[#allocation63_spill] sm:$0xff] }
  0xf5   :  { %2139 = vmatmul.mubr.f32.gmra.mrb[10].mxu1 %v4926_v7  ;;  %2736 = vmatprep.subr.bf16.mxu0 %v4028_v48  ;;  %v4942_v48 = vld [vmem:[#allocation70_spill] sm:$0xff] }
  0xf6   :  { %2926 = vmatpush1.bf16.msra.mxu1 %v4022_v2  ;;  %2144 = vmatprep.mubr.f32.mxu1 %v4737_v13  ;;  %v4941_v2 = vld [vmem:[#allocation61_spill] sm:$0xff] }
  0xf7   :  { %950 = vmatmul.mubr.f32.gmra.mrb[12].mxu0 %v4927_v51  ;;  %2928 = vmatprep.subr.bf16.mxu1 %v4035_v35  ;;  %v4943_v35 = vld [vmem:[#allocation72_spill] sm:$0xff] }
  0xf8   :  { %2738 = vmatpush1.bf16.msra.mxu0 %v4041_v50  ;;  %955 = vmatprep.mubr.f32.mxu0 %v4737_v13  ;;  %v4944_v50 = vld [vmem:[#allocation74_spill] sm:$0xff] }
  0xf9   :  { %2148 = vmatmul.mubr.f32.gmra.mrb[12].mxu1 %v4927_v51  ;;  %2740 = vmatprep.subr.bf16.mxu0 %v4054_v49  ;;  %v4946_v49 = vld [vmem:[#allocation65_spill] sm:$0xff] }
  0xfa   :  { %2930 = vmatpush1.bf16.msra.mxu1 %v4047_v22  ;;  %2153 = vmatprep.mubr.f32.mxu1 %v4737_v13  ;;  %v4945_v22 = vld [vmem:[#allocation73_spill] sm:$0xff] }
  0xfb   :  { %959 = vmatmul.mubr.f32.gmra.mrb[14].mxu0 %v4928_v8  ;;  %2932 = vmatprep.subr.bf16.mxu1 %v4060_v5  ;;  %v4947_v5 = vld [vmem:[#allocation77_spill] sm:$0xff] }
  0xfc   :  { %2742 = vmatpush1.bf16.msra.mxu0 %v4066_v60  ;;  %1125 = vmatprep.mubr.f32.mxu0 %v4737_v13  ;;  %v4948_v60 = vld [vmem:[#allocation78_spill] sm:$0xff] }
  0xfd   :  { %2157 = vmatmul.mubr.f32.gmra.mrb[14].mxu1 %v4928_v8  ;;  %2744 = vmatprep.subr.bf16.mxu0 %v4853_v29  ;;  %v4949_v29 = vld [vmem:[#allocation79_spill] sm:$0xff] }
  0xfe   :  { %2934 = vmatpush1.bf16.msra.mxu1 %v4075_v28  ;;  %2323 = vmatprep.mubr.f32.mxu1 %v4737_v13  ;;  %v4931_v28 = vld [vmem:[#allocation85_spill] sm:$0xff] }
  0xff   :  { %1127 = vmatmul.mubr.f32.vlgmr.msra.gmra.mrb[0].mxu0 %v4929_v15  ;;  %2936 = vmatprep.subr.bf16.mxu1 %v4855_v33 }
 0x100   :  { %2746 = vmatpush1.bf16.msra.mxu0 %v4856_v52  ;;  %1132 = vmatprep.mubr.f32.mxu0 %v4737_v13  ;;  %v115_v52 = vld [vmem:[%s4421_s2] sm:$0xf]  ;;  %s3246_s2 = smov [#allocation7]  }
 0x101   :  { %2325 = vmatmul.mubr.f32.vlgmr.msra.gmra.mrb[0].mxu1 %v4929_v15  ;;  %2748 = vmatprep.subr.bf16.mxu0 %v4857_v25  ;;  %s2570_s13 = sshll.u32 %s3246_s2, 4  ;;  %s2571_s13 = int_to_ptr.vmem [resolvable:$true] %s2570_s13 }
 0x102   :  { %2938 = vmatpush1.bf16.msra.mxu1 %v4858_v56  ;;  %2330 = vmatprep.mubr.f32.mxu1 %v4737_v13  ;;  %s3211_s14 = scalar_lea.vmem %s2571_s13, 4096  ;;  %p3216_p3 = scmp.lt.s32.totalorder %s2571_s13, %s2571_s13 }
 0x103   :  { %1134 = vmatmul.mubr.f32.gmra.mrb[2].mxu0 %v4930_v30  ;;  %2940 = vmatprep.subr.bf16.mxu1 %v4860_v4  ;;  %p3212_p2 = scmp.ne.s32.totalorder %s2571_s13, %s3211_s14  ;;  %p3217_p4 = scmp.lt.s32.totalorder %s3211_s14, %s3211_s14 }
 0x104   :  { %2750 = vmatpush1.bf16.msra.mxu0 %v4861_v43  ;;  %1139 = vmatprep.mubr.f32.mxu0 %v4737_v13 }
 0x105   :  { %2332 = vmatmul.mubr.f32.gmra.mrb[2].mxu1 %v4930_v30  ;;  %2752 = vmatprep.subr.bf16.mxu0 %v4862_v19  ;;  %p3218_p5 = por %p3217_p4, %p3216_p3 }
 0x106   :  { %2942 = vmatpush1.bf16.msra.mxu1 %v4863_v44  ;;  %2337 = vmatprep.mubr.f32.mxu1 %v4737_v13 }
 0x107   :  { %1141 = vmatmul.mubr.f32.gmra.mrb[4].mxu0 %v4931_v28  ;;  %2944 = vmatprep.subr.bf16.mxu1 %v4865_v61  ;;  %p3219_p6 = pnand %p3218_p5, %p3212_p2 }
 0x108   :  { %2754 = vmatpush1.bf16.msra.mxu0 %v4866_v37  ;;  %1146 = vmatprep.mubr.f32.mxu0 %v4737_v13 }
 0x109   :  { %2339 = vmatmul.mubr.f32.gmra.mrb[4].mxu1 %v4931_v28  ;;  %2756 = vmatprep.subr.bf16.mxu0 %v4867_v17 }
 0x10a   :  { %2946 = vmatpush1.bf16.msra.mxu1 %v4868_v42  ;;  %2344 = vmatprep.mubr.f32.mxu1 %v4737_v13 }
 0x10b   :  { %1148 = vmatmul.mubr.f32.gmra.mrb[6].mxu0 %v4832_v24  ;;  %2948 = vmatprep.subr.bf16.mxu1 %v4870_v58 }
 0x10c   :  { %2758 = vmatpush1.bf16.msra.mxu0 %v4871_v9  ;;  %1153 = vmatprep.mubr.f32.mxu0 %v4737_v13 }
 0x10d   :  { %2346 = vmatmul.mubr.f32.gmra.mrb[6].mxu1 %v4832_v24  ;;  %2760 = vmatprep.subr.bf16.mxu0 %v4872_v57 }
 0x10e   :  { %2950 = vmatpush1.bf16.msra.mxu1 %v4873_v32  ;;  %2351 = vmatprep.mubr.f32.mxu1 %v4737_v13 }
 0x10f   :  { %1155 = vmatmul.mubr.f32.gmra.mrb[8].mxu0 %v4849_v41  ;;  %2952 = vmatprep.subr.bf16.mxu1 %v4932_v10 }
 0x110   :  { %2762 = vmatpush1.bf16.msra.mxu0 %v4933_v20  ;;  %1160 = vmatprep.mubr.f32.mxu0 %v4737_v13 }
 0x111   :  { %2353 = vmatmul.mubr.f32.gmra.mrb[8].mxu1 %v4849_v41  ;;  %2764 = vmatprep.subr.bf16.mxu0 %v4934_v1 }
 0x112   :  { %2954 = vmatpush1.bf16.msra.mxu1 %v4935_v27  ;;  %2358 = vmatprep.mubr.f32.mxu1 %v4737_v13 }
 0x113   :  { %1162 = vmatmul.mubr.f32.gmra.mrb[10].mxu0 %v4936_v63  ;;  %2956 = vmatprep.subr.bf16.mxu1 %v4937_v6 }
 0x114   :  { %2766 = vmatpush1.bf16.msra.mxu0 %v4938_v14  ;;  %1167 = vmatprep.mubr.f32.mxu0 %v4737_v13 }
 0x115   :  { %2360 = vmatmul.mubr.f32.gmra.mrb[10].mxu1 %v4936_v63  ;;  %2768 = vmatprep.subr.bf16.mxu0 %v4939_v45 }
 0x116   :  { %2958 = vmatpush1.bf16.msra.mxu1 %v4940_v54  ;;  %2365 = vmatprep.mubr.f32.mxu1 %v4737_v13 }
 0x117   :  { %1169 = vmatmul.mubr.f32.gmra.mrb[12].mxu0 %v4941_v2  ;;  %2960 = vmatprep.subr.bf16.mxu1 %v4942_v48 }
 0x118   :  { %2770 = vmatpush1.bf16.msra.mxu0 %v4943_v35  ;;  %1174 = vmatprep.mubr.f32.mxu0 %v4737_v13 }
 0x119   :  { %2367 = vmatmul.mubr.f32.gmra.mrb[12].mxu1 %v4941_v2  ;;  %2772 = vmatprep.subr.bf16.mxu0 %v4944_v50 }
 0x11a   :  { %2962 = vmatpush1.bf16.msra.mxu1 %v4945_v22  ;;  %2372 = vmatprep.mubr.f32.mxu1 %v4737_v13 }
 0x11b   :  { %1176 = vmatmul.mubr.f32.gmra.mrb[14].mxu0 %v4946_v49  ;;  %2964 = vmatprep.subr.bf16.mxu1 %v4947_v5 }
 0x11c   :  { %2774 = vmatpush1.bf16.msra.mxu0 %v4948_v60  ;;  %1278 = vmatprep.mubr.f32.mxu0 %v4737_v13 }
 0x11d   :  { %2374 = vmatmul.mubr.f32.gmra.mrb[14].mxu1 %v4946_v49 }
 0x11e   :  { %2966 = vmatpush1.bf16.msra.mxu1 %v4949_v29  ;;  %2476 = vmatprep.mubr.f32.mxu1 %v4737_v13 }
 0x11f   :  { %1280 = vmatmul.mubr.f32.vlgmr.msra.gmra.mrb[0].mxu0 %v4929_v15 }
 0x120   :  { %1285 = vmatprep.mubr.f32.mxu0 %v4737_v13 }
 0x121   :  { %2478 = vmatmul.mubr.f32.vlgmr.msra.gmra.mrb[0].mxu1 %v4929_v15 }
 0x122   :  { %2483 = vmatprep.mubr.f32.mxu1 %v4737_v13 }
 0x123   :  { %1287 = vmatmul.mubr.f32.gmra.mrb[2].mxu0 %v4930_v30 }
 0x124   :  { %1292 = vmatprep.mubr.f32.mxu0 %v4737_v13 }
 0x125   :  { %2485 = vmatmul.mubr.f32.gmra.mrb[2].mxu1 %v4930_v30 }
 0x126   :  { %2490 = vmatprep.mubr.f32.mxu1 %v4737_v13 }
 0x127   :  { %1294 = vmatmul.mubr.f32.gmra.mrb[4].mxu0 %v4931_v28 }
 0x128   :  { %1299 = vmatprep.mubr.f32.mxu0 %v4737_v13 }
 0x129   :  { %2492 = vmatmul.mubr.f32.gmra.mrb[4].mxu1 %v4931_v28 }
 0x12a   :  { %2497 = vmatprep.mubr.f32.mxu1 %v4737_v13 }
 0x12b   :  { %1301 = vmatmul.mubr.f32.gmra.mrb[6].mxu0 %v4832_v24 }
 0x12c   :  { %1306 = vmatprep.mubr.f32.mxu0 %v4737_v13 }
 0x12d   :  { %2499 = vmatmul.mubr.f32.gmra.mrb[6].mxu1 %v4832_v24  ;;  %v117_v24 = vlaneseq }
 0x12e   :  { %2504 = vmatprep.mubr.f32.mxu1 %v4737_v13 }
 0x12f   :  { %1308 = vmatmul.mubr.f32.gmra.mrb[8].mxu0 %v4849_v41 }
 0x130   :  { %1313 = vmatprep.mubr.f32.mxu0 %v4737_v13 }
 0x131   :  { %2506 = vmatmul.mubr.f32.gmra.mrb[8].mxu1 %v4849_v41  ;;  %v118_v41 = vshrl.u32 %v117_v24, 7 }
 0x132   :  { %2511 = vmatprep.mubr.f32.mxu1 %v4737_v13 }
 0x133   :  { %1315 = vmatmul.mubr.f32.gmra.mrb[10].mxu0 %v4936_v63  ;;  %v119_v33 = vsub.s32 0, %v118_v41  ;;  %v123_v25 = vsub.s32 1, %v118_v41  ;;  %v127_v56 = vsub.s32 2, %v118_v41  ;;  %v131_v4 = vsub.s32 3, %v118_v41 }
 0x134   :  { %1320 = vmatprep.mubr.f32.mxu0 %v4737_v13 }
 0x135   :  { %2513 = vmatmul.mubr.f32.gmra.mrb[10].mxu1 %v4936_v63  ;;  %v4364_v43 = vrot.slane %v115_v52, %v119_v33  ;;  %v4366_v19 = vrot.slane %v115_v52, %v123_v25  ;;  %v4368_v44 = vrot.slane %v115_v52, %v127_v56  ;;  %v4370_v61 = vrot.slane %v115_v52, %v131_v4 }
 0x136   :  { %2518 = vmatprep.mubr.f32.mxu1 %v4737_v13 }
 0x137   :  { %1322 = vmatmul.mubr.f32.gmra.mrb[12].mxu0 %v4941_v2 }
 0x138   :  { %1327 = vmatprep.mubr.f32.mxu0 %v4737_v13 }
 0x139   :  { %2520 = vmatmul.mubr.f32.gmra.mrb[12].mxu1 %v4941_v2 }
 0x13a   :  { %2525 = vmatprep.mubr.f32.mxu1 %v4737_v13 }
 0x13b   :  { %1329 = vmatmul.mubr.f32.gmra.mrb[14].mxu0 %v4946_v49 }
 0x13d   :  { %2527 = vmatmul.mubr.f32.gmra.mrb[14].mxu1 %v4946_v49 }
 0x1f2   :  { %v1281_v13 = vpop.f32.mrb[0].mxu0 }
 0x1f3   :  { %v2967_v37 = vadd.f32 %v1281_v13, %v4364_v43  ;;  %v1283_v17 = vpop.f32.mrb[1].mxu0 }
 0x1f4   :  { %v2479_v42 = vpop.f32.mrb[0].mxu1  ;;  %v2968_v58 = vadd.f32 %v1283_v17, %v4366_v19 }
 0x1f5   :  { %2533 = vst [vmem:[#allocation7] sm:$0xff] %v2967_v37  ;;  %v2983_v9 = vadd.f32 %v2479_v42, %v4368_v44  ;;  %v2481_v57 = vpop.f32.mrb[1].mxu1 }
 0x1f6   :  { %2534 = vst [vmem:[#allocation7 + $0x8] sm:$0xff] %v2968_v58  ;;  %v2984_v32 = vadd.f32 %v2481_v57, %v4370_v61  ;;  %v1288_v18 = vpop.f32.mrb[2].mxu0 }
 0x1f7   :  { %2535 = vst [vmem:[#allocation7 + $0x10] sm:$0xff] %v2983_v9  ;;  %v2969_v26 = vadd.f32 %v1288_v18, %v4364_v43  ;;  %v1290_v46 = vpop.f32.mrb[3].mxu0 }
 0x1f8   :  { %2536 = vst [vmem:[#allocation7 + $0x18] sm:$0xff] %v2984_v32  ;;  %v2486_v23 = vpop.f32.mrb[2].mxu1  ;;  %v2970_v21 = vadd.f32 %v1290_v46, %v4366_v19 }
 0x1f9   :  { %2537 = vst [vmem:[#allocation7 + $0x20] sm:$0xff] %v2969_v26  ;;  %v2985_v40 = vadd.f32 %v2486_v23, %v4368_v44  ;;  %v2488_v39 = vpop.f32.mrb[3].mxu1 }
 0x1fa   :  { %2538 = vst [vmem:[#allocation7 + $0x28] sm:$0xff] %v2970_v21  ;;  %v2986_v16 = vadd.f32 %v2488_v39, %v4370_v61  ;;  %v1295_v12 = vpop.f32.mrb[4].mxu0 }
 0x1fb   :  { %2539 = vst [vmem:[#allocation7 + $0x30] sm:$0xff] %v2985_v40  ;;  %v2971_v38 = vadd.f32 %v1295_v12, %v4364_v43  ;;  %v1297_v3 = vpop.f32.mrb[5].mxu0 }
 0x1fc   :  { %2540 = vst [vmem:[#allocation7 + $0x38] sm:$0xff] %v2986_v16  ;;  %v2493_v36 = vpop.f32.mrb[4].mxu1  ;;  %v2972_v0 = vadd.f32 %v1297_v3, %v4366_v19 }
 0x1fd   :  { %2541 = vst [vmem:[#allocation7 + $0x40] sm:$0xff] %v2971_v38  ;;  %v2987_v59 = vadd.f32 %v2493_v36, %v4368_v44  ;;  %v2495_v62 = vpop.f32.mrb[5].mxu1 }
 0x1fe   :  { %2542 = vst [vmem:[#allocation7 + $0x48] sm:$0xff] %v2972_v0  ;;  %v2988_v55 = vadd.f32 %v2495_v62, %v4370_v61  ;;  %v1302_v53 = vpop.f32.mrb[6].mxu0 }
 0x1ff   :  { %2543 = vst [vmem:[#allocation7 + $0x50] sm:$0xff] %v2987_v59  ;;  %v2973_v31 = vadd.f32 %v1302_v53, %v4364_v43  ;;  %v1304_v11 = vpop.f32.mrb[7].mxu0 }
 0x200   :  { %2544 = vst [vmem:[#allocation7 + $0x58] sm:$0xff] %v2988_v55  ;;  %v2500_v34 = vpop.f32.mrb[6].mxu1  ;;  %v2974_v47 = vadd.f32 %v1304_v11, %v4366_v19 }
 0x201   :  { %2545 = vst [vmem:[#allocation7 + $0x60] sm:$0xff] %v2973_v31  ;;  %v2989_v7 = vadd.f32 %v2500_v34, %v4368_v44  ;;  %v2502_v51 = vpop.f32.mrb[7].mxu1 }
 0x202   :  { %2546 = vst [vmem:[#allocation7 + $0x68] sm:$0xff] %v2974_v47  ;;  %v2990_v8 = vadd.f32 %v2502_v51, %v4370_v61  ;;  %v1309_v15 = vpop.f32.mrb[8].mxu0 }
 0x203   :  { %2547 = vst [vmem:[#allocation7 + $0x70] sm:$0xff] %v2989_v7  ;;  %v2975_v30 = vadd.f32 %v1309_v15, %v4364_v43  ;;  %v1311_v28 = vpop.f32.mrb[9].mxu0 }
 0x204   :  { %2548 = vst [vmem:[#allocation7 + $0x78] sm:$0xff] %v2990_v8  ;;  %v2507_v10 = vpop.f32.mrb[8].mxu1  ;;  %v2976_v20 = vadd.f32 %v1311_v28, %v4366_v19 }
 0x205   :  { %2549 = vst [vmem:[#allocation7 + $0x80] sm:$0xff] %v2975_v30  ;;  %v2991_v1 = vadd.f32 %v2507_v10, %v4368_v44  ;;  %v2509_v27 = vpop.f32.mrb[9].mxu1 }
 0x206   :  { %2550 = vst [vmem:[#allocation7 + $0x88] sm:$0xff] %v2976_v20  ;;  %v2992_v63 = vadd.f32 %v2509_v27, %v4370_v61  ;;  %v1316_v6 = vpop.f32.mrb[10].mxu0 }
 0x207   :  { %2551 = vst [vmem:[#allocation7 + $0x90] sm:$0xff] %v2991_v1  ;;  %v2977_v14 = vadd.f32 %v1316_v6, %v4364_v43  ;;  %v1318_v45 = vpop.f32.mrb[11].mxu0 }
 0x208   :  { %2552 = vst [vmem:[#allocation7 + $0x98] sm:$0xff] %v2992_v63  ;;  %v2514_v54 = vpop.f32.mrb[10].mxu1  ;;  %v2978_v2 = vadd.f32 %v1318_v45, %v4366_v19 }
 0x209   :  { %2553 = vst [vmem:[#allocation7 + $0xa0] sm:$0xff] %v2977_v14  ;;  %v2993_v48 = vadd.f32 %v2514_v54, %v4368_v44  ;;  %v2516_v35 = vpop.f32.mrb[11].mxu1 }
 0x20a   :  { %2554 = vst [vmem:[#allocation7 + $0xa8] sm:$0xff] %v2978_v2  ;;  %v2994_v50 = vadd.f32 %v2516_v35, %v4370_v61  ;;  %v1323_v22 = vpop.f32.mrb[12].mxu0 }
 0x20b   :  { %2555 = vst [vmem:[#allocation7 + $0xb0] sm:$0xff] %v2993_v48  ;;  %v2979_v49 = vadd.f32 %v1323_v22, %v4364_v43  ;;  %v1325_v5 = vpop.f32.mrb[13].mxu0 }
 0x20c   :  { %2556 = vst [vmem:[#allocation7 + $0xb8] sm:$0xff] %v2994_v50  ;;  %v2521_v60 = vpop.f32.mrb[12].mxu1  ;;  %v2980_v29 = vadd.f32 %v1325_v5, %v4366_v19 }
 0x20d   :  { %2557 = vst [vmem:[#allocation7 + $0xc0] sm:$0xff] %v2979_v49  ;;  %v2995_v24 = vadd.f32 %v2521_v60, %v4368_v44  ;;  %v2523_v41 = vpop.f32.mrb[13].mxu1 }
 0x20e   :  { %2558 = vst [vmem:[#allocation7 + $0xc8] sm:$0xff] %v2980_v29  ;;  %v2996_v33 = vadd.f32 %v2523_v41, %v4370_v61  ;;  %v1330_v52 = vpop.f32.mrb[14].mxu0 }
 0x20f   :  { %2559 = vst [vmem:[#allocation7 + $0xd0] sm:$0xff] %v2995_v24  ;;  %v2981_v25 = vadd.f32 %v1330_v52, %v4364_v43  ;;  %v1332_v56 = vpop.f32.mrb[15].mxu0 }
 0x210   :  { %2560 = vst [vmem:[#allocation7 + $0xd8] sm:$0xff] %v2996_v33  ;;  %v2528_v4 = vpop.f32.mrb[14].mxu1  ;;  %v2982_v13 = vadd.f32 %v1332_v56, %v4366_v19 }
 0x211   :  { %2561 = vst [vmem:[#allocation7 + $0xe0] sm:$0xff] %v2981_v25  ;;  %v2997_v37 = vadd.f32 %v2528_v4, %v4368_v44  ;;  %v2530_v17 = vpop.f32.mrb[15].mxu1 }
 0x212   :  { %2562 = vst [vmem:[#allocation7 + $0xe8] sm:$0xff] %v2982_v13  ;;  %v2998_v42 = vadd.f32 %v2530_v17, %v4370_v61 }
 0x213   :  { %2563 = vst [vmem:[#allocation7 + $0xf0] sm:$0xff] %v2997_v37 }
 0x214   :  { %2564 = vst [vmem:[#allocation7 + $0xf8] sm:$0xff] %v2998_v42 }
 0x215   :  { %3222 = shalt.err (!%p3219_p6)
}
 0x216   :  { %s3223_s17 = scalar_lea.hbm %s4422_s3, 4096 }
 0x217   :  { %p3224_p7 = scmp.ne.s32.totalorder %s4422_s3, %s3223_s17  ;;  %p3227_p8 = scmp.lt.u32.totalorder %s3223_s17, %s4422_s3 }
 0x219   :  { %p3229_p9 = pnand %p3227_p8, %p3224_p7 }
 0x21b   :  { %3232 = shalt.err (!%p3229_p9)
}
 0x21c   :  { %2576 = dma.vmem_to_hbm [thread:$0]  %s2571_s13, 4096, %s4422_s3, [#allocation4], %s3243_s0, %s3243_s0, %s3244_s9  }
 0x21d   :  { %3237 = dma.done.wait [#allocation4], 4096  }
 0x21e   :  { %3238 = vsyncadd [#allocation4], 4294963200 }
 0x21f   :  { %2580 = vsyncpa [#allocation3], 1 }
 0x220   :  { %2581 = vsyncpa [#allocation6], 1 }
 0x221   :  { %2582 = vsyncpa [#allocation4], 1 }

</bundles_post_ra>
